<compile_context>
chip_gen: v7x
topology: tpu7x:2x2x1
jax: 0.10.0
libtpu: 0.0.40
codegen_flags: <defaults>
</compile_context>

<pallas_src>
import functools
import math

import jax
import jax.numpy as jnp
from jax.experimental import pallas as pl
from jax.experimental.pallas import tpu as pltpu  # noqa: F401  (kept for TPU-specific tuning hooks)

# ------------------------- small synthetic BERT config -------------------------
VOCAB = 100
MAX_POS = 16
NUM_SEGMENTS = 2          # TransformerEncoder.Config.num_segments default
HIDDEN = 32
NUM_HEADS = 4
HEAD_DIM = HIDDEN // NUM_HEADS
INTERMEDIATE = 64
NUM_LAYERS = 2
LN_EPS = 1e-12


# ------------------------------ shared math helpers -----------------------------
def _layernorm(x, gamma, beta):
    mu = jnp.mean(x, axis=-1, keepdims=True)
    var = jnp.mean((x - mu) ** 2, axis=-1, keepdims=True)
    return (x - mu) * jax.lax.rsqrt(var + LN_EPS) * gamma + beta


def _gelu(x):
    # tanh-approximate GELU (BERT's erf gelu is numerically near-identical)
    return 0.5 * x * (1.0 + jnp.tanh(0.7978845608028654 * (x + 0.044715 * x * x * x)))


# ------------------------------- Pallas kernels ---------------------------------
def bert_forward_kernel(emb_ref, emb_g_ref, emb_b_ref,
                        wqkv_ref, bqkv_ref, wo_ref, bo_ref,
                        ln1g_ref, ln1b_ref,
                        w1_ref, b1_ref, w2_ref, b2_ref,
                        ln2g_ref, ln2b_ref,
                        poolw_ref, poolb_ref,
                        seq_ref, pooled_ref):
    """Fused BERT forward: emb-LN + all layers + pooler in a single kernel.

    All parameters and activations fit VMEM comfortably at these sizes, so the
    whole forward is one launch and activations never touch HBM between layers.
    """
    B, S, H = emb_ref.shape
    N = B * S
    scale = 1.0 / math.sqrt(HEAD_DIM)

    # embedding layernorm, batch+seq flattened to (B*S, H) rows
    x = _layernorm(emb_ref[...].reshape(N, H), emb_g_ref[...], emb_b_ref[...])

    for layer in range(NUM_LAYERS):                      # static, fully unrolled
        xb = x.astype(jnp.bfloat16)
        # packed QKV: one (N,H)x(H,3H) bf16 matmul, f32 accumulation
        qkv = jnp.dot(xb, wqkv_ref[layer],
                      preferred_element_type=jnp.float32) + bqkv_ref[layer]
        q = qkv[:, 0 * H:1 * H].reshape(B, S, H)
        k = qkv[:, 1 * H:2 * H].reshape(B, S, H)
        v = qkv[:, 2 * H:3 * H].reshape(B, S, H)

        wo = wo_ref[layer]                               # (H, H) f32
        attn = jnp.zeros((N, H), jnp.float32)
        for h in range(NUM_HEADS):                       # static head loop, batched over B
            lo = h * HEAD_DIM
            qh = q[:, :, lo:lo + HEAD_DIM]               # (B, S, HD)
            kh = k[:, :, lo:lo + HEAD_DIM]
            vh = v[:, :, lo:lo + HEAD_DIM]
            s = jnp.einsum('bqd,bkd->bqk', qh, kh,
                           preferred_element_type=jnp.float32) * scale
            s = s - jnp.max(s, axis=-1, keepdims=True)
            p = jnp.exp(s)
            p = p * pl.reciprocal(jnp.sum(p, axis=-1, keepdims=True), approx=True)
            ctx = jnp.einsum('bqk,bkd->bqd', p, vh,
                             preferred_element_type=jnp.float32)     # (B, S, HD)
            # fold the output projection per head: ctx_h @ Wo[head rows].
            # mathematically identical to concat(ctx_h) @ Wo but avoids the
            # 8-lane-wide concat along the lane axis.
            attn = attn + jnp.dot(ctx.reshape(N, HEAD_DIM),
                                  wo[lo:lo + HEAD_DIM, :],
                                  preferred_element_type=jnp.float32)
        attn = attn + bo_ref[layer]
        h1 = _layernorm(x + attn, ln1g_ref[layer], ln1b_ref[layer])

        ff = _gelu(jnp.dot(h1.astype(jnp.bfloat16), w1_ref[layer],
                           preferred_element_type=jnp.float32) + b1_ref[layer])
        ff = jnp.dot(ff.astype(jnp.bfloat16), w2_ref[layer],
                     preferred_element_type=jnp.float32) + b2_ref[layer]
        x = _layernorm(h1 + ff, ln2g_ref[layer], ln2b_ref[layer])

    x3 = x.reshape(B, S, H)
    seq_ref[...] = x3                                    # sequence_output
    cls = x3[:, 0, :]                                    # (B, H) CLS tokens
    pooled_ref[...] = jnp.tanh(                          # pooled_output
        jnp.dot(cls.astype(jnp.bfloat16), poolw_ref[...],
                preferred_element_type=jnp.float32) + poolb_ref[...])


def seq_reduce_kernel(x_ref, o_ref, *, op):
    # Reduce (B, S, H) over the sequence axis in one step for the whole batch.
    # Static unrolled reduce (S is tiny) keeps the lowering trivially safe.
    x = x_ref[...]
    B, S, H = x.shape
    acc = x[:, 0, :]
    if op == "sum":
        for i in range(1, S):
            acc = acc + x[:, i, :]
    else:  # "mul"
        for i in range(1, S):
            acc = acc * x[:, i, :]
    o_ref[...] = acc


# ----------------------------- pallas_call wrappers ------------------------------
def bert_forward(emb, p):
    B, S, H = emb.shape
    return pl.pallas_call(
        bert_forward_kernel,
        out_shape=(jax.ShapeDtypeStruct((B, S, H), jnp.float32),   # sequence_output
                   jax.ShapeDtypeStruct((B, H), jnp.float32)),     # pooled_output
    )(emb, p["emb_ln_g"], p["emb_ln_b"],
      p["wqkv"], p["bqkv"], p["wo"], p["bo"],
      p["ln1_g"], p["ln1_b"],
      p["w1"], p["b1"], p["w2"], p["b2"],
      p["ln2_g"], p["ln2_b"],
      p["pool_w"], p["pool_b"])


def seq_reduce(x, op):
    B, S, H = x.shape
    return pl.pallas_call(
        functools.partial(seq_reduce_kernel, op=op),
        out_shape=jax.ShapeDtypeStruct((B, H), jnp.float32),
    )(x)


# ------------------------------- parameter init ---------------------------------
def init_params(key):
    k_word, k_pos, k_type, k_pool, k_qkv, k_wo, k_w1, k_w2 = jax.random.split(key, 8)

    def nrm(k, shape, dtype=jnp.float32):
        return (jax.random.normal(k, shape, jnp.float32) * 0.02).astype(dtype)

    L, H, I = NUM_LAYERS, HIDDEN, INTERMEDIATE
    return {
        "word_emb": nrm(k_word, (VOCAB, H)),
        "pos_emb": nrm(k_pos, (MAX_POS, H)),
        "type_emb": nrm(k_type, (NUM_SEGMENTS, H)),
        "emb_ln_g": jnp.ones((1, H), jnp.float32),
        "emb_ln_b": jnp.zeros((1, H), jnp.float32),
        # stacked per-layer weights; matmul weights in bf16 (f32 accumulation in-kernel)
        "wqkv": nrm(k_qkv, (L, H, 3 * H), jnp.bfloat16),   # packed Q|K|V
        "bqkv": jnp.zeros((L, 1, 3 * H), jnp.float32),
        "wo": nrm(k_wo, (L, H, H)),                        # f32: per-head row slices stay tile-aligned
        "bo": jnp.zeros((L, 1, H), jnp.float32),
        "ln1_g": jnp.ones((L, 1, H), jnp.float32),
        "ln1_b": jnp.zeros((L, 1, H), jnp.float32),
        "w1": nrm(k_w1, (L, H, I), jnp.bfloat16),
        "b1": jnp.zeros((L, 1, I), jnp.float32),
        "w2": nrm(k_w2, (L, I, H), jnp.bfloat16),
        "b2": jnp.zeros((L, 1, H), jnp.float32),
        "ln2_g": jnp.ones((L, 1, H), jnp.float32),
        "ln2_b": jnp.zeros((L, 1, H), jnp.float32),
        "pool_w": nrm(k_pool, (H, H), jnp.bfloat16),
        "pool_b": jnp.zeros((1, H), jnp.float32),
    }


# ------------------------------ pure-JAX reference -------------------------------
def _bert_reference(emb, p):
    B, S, H = emb.shape
    f32 = lambda a: a.astype(jnp.float32)
    x = _layernorm(emb.reshape(B * S, H), p["emb_ln_g"], p["emb_ln_b"])
    for l in range(NUM_LAYERS):
        qkv = x @ f32(p["wqkv"][l]) + p["bqkv"][l]
        q = qkv[:, :H].reshape(B, S, H)
        k = qkv[:, H:2 * H].reshape(B, S, H)
        v = qkv[:, 2 * H:].reshape(B, S, H)
        ctx = []
        for h in range(NUM_HEADS):
            sl = slice(h * HEAD_DIM, (h + 1) * HEAD_DIM)
            s = jnp.einsum('bqd,bkd->bqk', q[..., sl], k[..., sl]) / math.sqrt(HEAD_DIM)
            pm = jax.nn.softmax(s, axis=-1)
            ctx.append(jnp.einsum('bqk,bkd->bqd', pm, v[..., sl]))
        ctx = jnp.concatenate(ctx, axis=-1).reshape(B * S, H)
        attn = ctx @ p["wo"][l] + p["bo"][l]
        h1 = _layernorm(x + attn, p["ln1_g"][l], p["ln1_b"][l])
        ff = _gelu(h1 @ f32(p["w1"][l]) + p["b1"][l])
        ff = ff @ f32(p["w2"][l]) + p["b2"][l]
        x = _layernorm(h1 + ff, p["ln2_g"][l], p["ln2_b"][l])
    seq = x.reshape(B, S, H)
    pooled = jnp.tanh(seq[:, 0, :] @ f32(p["pool_w"]) + p["pool_b"])
    return seq, pooled


# ------------------------------ TextEncoderFactory -------------------------------
class TextEncoderFactory:
    """JAX/Pallas re-implementation of mmf TextEncoderFactory.forward."""

    def __init__(self, enc_type, params=None, operator="sum"):
        if enc_type not in ("identity", "transformer", "embedding"):
            raise NotImplementedError(f"Unknown Text Encoder {enc_type}")
        self._type = enc_type
        self._params = params
        self._operator = operator

    # -- transformer path: self.module is the BertModel, which returns
    #    (sequence_output, pooled_output) --
    def _transformer_forward(self, input_ids, token_type_ids=None):
        p = self._params
        B, S = input_ids.shape
        assert S <= MAX_POS, f"sequence length {S} exceeds max positions {MAX_POS}"
        if token_type_ids is None:
            token_type_ids = jnp.zeros((B, S), jnp.int32)
        pos_ids = jnp.arange(S, dtype=jnp.int32)

        # embedding gathers are plain-JAX glue; everything downstream is one fused kernel
        emb = (jnp.take(p["word_emb"], input_ids, axis=0)
               + jnp.take(p["pos_emb"], pos_ids, axis=0)[None, :, :]
               + jnp.take(p["type_emb"], token_type_ids, axis=0)).astype(jnp.float32)
        seq_out, pooled = bert_forward(emb, p)
        return seq_out, pooled

    # -- embedding path: lookup, reduce over seq (operator), squeeze --
    def _embedding_forward(self, input_ids):
        p = self._params
        emb = jnp.take(p["word_emb"], input_ids, axis=0).astype(jnp.float32)
        if self._operator in ("sum", "mul"):
            out = seq_reduce(emb, self._operator)            # (B, H)
        elif self._operator == "concat":
            # torch.cat(x, dim=1): pure layout reshuffle, no compute to kernelize
            out = jnp.concatenate(list(emb), axis=1)         # (S, B*H)
        else:
            raise NotImplementedError(f"Unknown operator {self._operator}")
        return jnp.squeeze(out)                              # matches torch .squeeze()

    def forward(self, *args, **kwargs):
        if self._type == "identity":
            return args[0]
        if self._type == "transformer":
            return self._transformer_forward(*args, **kwargs)
        return self._embedding_forward(*args, **kwargs)

    __call__ = forward


# ------------------------------------- main --------------------------------------
if __name__ == "__main__":
    key = jax.random.PRNGKey(0)
    pkey, dkey = jax.random.split(key)
    params = init_params(pkey)

    B, S = 2, 8
    input_ids = jax.random.randint(dkey, (B, S), 0, VOCAB, dtype=jnp.int32)
    token_type_ids = jnp.zeros((B, S), jnp.int32)

    # transformer type (fused single-kernel BERT forward, returns (seq, pooled))
    factory_tf = TextEncoderFactory("transformer", params=params)
    seq_out, pooled = factory_tf(input_ids, token_type_ids)
    jax.block_until_ready((seq_out, pooled))
    assert seq_out.shape == (B, S, HIDDEN)
    assert pooled.shape == (B, HIDDEN)
    assert bool(jnp.all(jnp.isfinite(pooled)))

    # numerical check against a pure-JAX reference (bf16 matmuls + approx recip -> loose tol)
    emb_in = (jnp.take(params["word_emb"], input_ids, axis=0)
              + jnp.take(params["pos_emb"], jnp.arange(S, dtype=jnp.int32), axis=0)[None, :, :]
              + jnp.take(params["type_emb"], token_type_ids, axis=0)).astype(jnp.float32)
    ref_seq, ref_pooled = _bert_reference(emb_in, params)
    assert bool(jnp.allclose(seq_out, ref_seq, atol=5e-2, rtol=5e-2))
    assert bool(jnp.allclose(pooled, ref_pooled, atol=5e-2, rtol=5e-2))

    # embedding type: sum and mul operators (single whole-batch Pallas reduce)
    factory_sum = TextEncoderFactory("embedding", params=params, operator="sum")
    summed = factory_sum(input_ids)
    jax.block_until_ready(summed)
    emb_tok = jnp.take(params["word_emb"], input_ids, axis=0)
    assert summed.shape == (B, HIDDEN)
    assert bool(jnp.allclose(summed, jnp.sum(emb_tok, axis=1), atol=1e-5))

    factory_mul = TextEncoderFactory("embedding", params=params, operator="mul")
    prod = factory_mul(input_ids)
    jax.block_until_ready(prod)
    assert prod.shape == (B, HIDDEN)

    # identity type
    factory_id = TextEncoderFactory("identity")
    ident = factory_id(input_ids)
    jax.block_until_ready(ident)
    assert ident.shape == (B, S)

    print("KERNEL_OK")
</pallas_src>

<mosaic_0001>
module attributes {stable_mosaic.version = 11 : i64} {
  func.func @bert_forward_kernel(%arg0: memref<2x8x32xf32, #tpu.memory_space<vmem>>, %arg1: memref<1x32xf32, #tpu.memory_space<vmem>>, %arg2: memref<1x32xf32, #tpu.memory_space<vmem>>, %arg3: memref<2x32x96xbf16, #tpu.memory_space<vmem>>, %arg4: memref<2x1x96xf32, #tpu.memory_space<vmem>>, %arg5: memref<2x32x32xf32, #tpu.memory_space<vmem>>, %arg6: memref<2x1x32xf32, #tpu.memory_space<vmem>>, %arg7: memref<2x1x32xf32, #tpu.memory_space<vmem>>, %arg8: memref<2x1x32xf32, #tpu.memory_space<vmem>>, %arg9: memref<2x32x64xbf16, #tpu.memory_space<vmem>>, %arg10: memref<2x1x64xf32, #tpu.memory_space<vmem>>, %arg11: memref<2x64x32xbf16, #tpu.memory_space<vmem>>, %arg12: memref<2x1x32xf32, #tpu.memory_space<vmem>>, %arg13: memref<2x1x32xf32, #tpu.memory_space<vmem>>, %arg14: memref<2x1x32xf32, #tpu.memory_space<vmem>>, %arg15: memref<32x32xbf16, #tpu.memory_space<vmem>>, %arg16: memref<1x32xf32, #tpu.memory_space<vmem>>, %arg17: memref<2x8x32xf32, #tpu.memory_space<vmem>>, %arg18: memref<2x32xf32, #tpu.memory_space<vmem>>) attributes {dimension_semantics = [], scalar_prefetch = 0 : i64, scratch_operands = 0 : i64, tpu.core_type = #tpu.core_type<tc>} {
    %c0 = arith.constant 0 : index
    %c0_0 = arith.constant 0 : index
    %c0_1 = arith.constant 0 : index
    %0 = vector.load %arg0[%c0, %c0_0, %c0_1] : memref<2x8x32xf32, #tpu.memory_space<vmem>>, vector<2x8x32xf32>
    %1 = vector.shape_cast %0 : vector<2x8x32xf32> to vector<16x32xf32>
    %c0_2 = arith.constant 0 : index
    %c0_3 = arith.constant 0 : index
    %2 = vector.load %arg1[%c0_2, %c0_3] : memref<1x32xf32, #tpu.memory_space<vmem>>, vector<1x32xf32>
    %c0_4 = arith.constant 0 : index
    %c0_5 = arith.constant 0 : index
    %3 = vector.load %arg2[%c0_4, %c0_5] : memref<1x32xf32, #tpu.memory_space<vmem>>, vector<1x32xf32>
    %cst = arith.constant dense<0.000000e+00> : vector<16xf32>
    %4 = vector.multi_reduction <add>, %1, %cst [1] : vector<16x32xf32> to vector<16xf32>
    %5 = vector.shape_cast %4 : vector<16xf32> to vector<16x1xf32>
    %cst_6 = arith.constant 3.200000e+01 : f32
    %6 = vector.broadcast %cst_6 : f32 to vector<16x1xf32>
    %7 = arith.divf %5, %6 : vector<16x1xf32>
    %8 = vector.broadcast %7 : vector<16x1xf32> to vector<16x32xf32>
    %9 = arith.subf %1, %8 : vector<16x32xf32>
    %10 = arith.mulf %9, %9 : vector<16x32xf32>
    %cst_7 = arith.constant dense<0.000000e+00> : vector<16xf32>
    %11 = vector.multi_reduction <add>, %10, %cst_7 [1] : vector<16x32xf32> to vector<16xf32>
    %12 = vector.shape_cast %11 : vector<16xf32> to vector<16x1xf32>
    %cst_8 = arith.constant 3.200000e+01 : f32
    %13 = vector.broadcast %cst_8 : f32 to vector<16x1xf32>
    %14 = arith.divf %12, %13 : vector<16x1xf32>
    %15 = vector.broadcast %7 : vector<16x1xf32> to vector<16x32xf32>
    %16 = arith.subf %1, %15 : vector<16x32xf32>
    %cst_9 = arith.constant 9.99999996E-13 : f32
    %17 = vector.broadcast %cst_9 : f32 to vector<16x1xf32>
    %18 = arith.addf %14, %17 : vector<16x1xf32>
    %19 = math.rsqrt %18 : vector<16x1xf32>
    %20 = vector.broadcast %19 : vector<16x1xf32> to vector<16x32xf32>
    %21 = arith.mulf %16, %20 : vector<16x32xf32>
    %22 = vector.broadcast %2 : vector<1x32xf32> to vector<16x32xf32>
    %23 = arith.mulf %21, %22 : vector<16x32xf32>
    %24 = vector.broadcast %3 : vector<1x32xf32> to vector<16x32xf32>
    %25 = arith.addf %23, %24 : vector<16x32xf32>
    %26 = arith.truncf %25 : vector<16x32xf32> to vector<16x32xbf16>
    %c0_10 = arith.constant 0 : index
    %c0_11 = arith.constant 0 : index
    %c0_12 = arith.constant 0 : index
    %27 = vector.load %arg3[%c0_10, %c0_11, %c0_12] : memref<2x32x96xbf16, #tpu.memory_space<vmem>>, vector<1x32x96xbf16>
    %28 = vector.shape_cast %27 : vector<1x32x96xbf16> to vector<32x96xbf16>
    %cst_13 = arith.constant dense<0.000000e+00> : vector<16x96xf32>
    %29 = tpu.matmul %26, %28, %cst_13 {dimension_numbers = #tpu.dot_dimension_numbers<[1], [0], [0], [1], [0, 0, 1, 1], [], []>} : vector<16x32xbf16>, vector<32x96xbf16>, vector<16x96xf32> -> vector<16x96xf32>
    %c0_14 = arith.constant 0 : index
    %c0_15 = arith.constant 0 : index
    %c0_16 = arith.constant 0 : index
    %30 = vector.load %arg4[%c0_14, %c0_15, %c0_16] : memref<2x1x96xf32, #tpu.memory_space<vmem>>, vector<1x1x96xf32>
    %31 = vector.shape_cast %30 : vector<1x1x96xf32> to vector<1x96xf32>
    %32 = vector.broadcast %31 : vector<1x96xf32> to vector<16x96xf32>
    %33 = arith.addf %29, %32 : vector<16x96xf32>
    %34 = vector.extract_strided_slice %33 {offsets = [0, 0], sizes = [16, 32], strides = [1, 1]} : vector<16x96xf32> to vector<16x32xf32>
    %35 = vector.shape_cast %34 : vector<16x32xf32> to vector<2x8x32xf32>
    %36 = vector.extract_strided_slice %33 {offsets = [0, 32], sizes = [16, 32], strides = [1, 1]} : vector<16x96xf32> to vector<16x32xf32>
    %37 = vector.shape_cast %36 : vector<16x32xf32> to vector<2x8x32xf32>
    %38 = vector.extract_strided_slice %33 {offsets = [0, 64], sizes = [16, 32], strides = [1, 1]} : vector<16x96xf32> to vector<16x32xf32>
    %39 = vector.shape_cast %38 : vector<16x32xf32> to vector<2x8x32xf32>
    %c0_17 = arith.constant 0 : index
    %c0_18 = arith.constant 0 : index
    %c0_19 = arith.constant 0 : index
    %40 = vector.load %arg5[%c0_17, %c0_18, %c0_19] : memref<2x32x32xf32, #tpu.memory_space<vmem>>, vector<1x32x32xf32>
    %41 = vector.shape_cast %40 : vector<1x32x32xf32> to vector<32x32xf32>
    %cst_20 = arith.constant 0.000000e+00 : f32
    %42 = vector.broadcast %cst_20 : f32 to vector<16x32xf32>
    %43 = vector.extract_strided_slice %35 {offsets = [0, 0, 0], sizes = [2, 8, 8], strides = [1, 1, 1]} : vector<2x8x32xf32> to vector<2x8x8xf32>
    %44 = vector.extract_strided_slice %37 {offsets = [0, 0, 0], sizes = [2, 8, 8], strides = [1, 1, 1]} : vector<2x8x32xf32> to vector<2x8x8xf32>
    %45 = vector.extract_strided_slice %39 {offsets = [0, 0, 0], sizes = [2, 8, 8], strides = [1, 1, 1]} : vector<2x8x32xf32> to vector<2x8x8xf32>
    "tpu.trace_start"() <{level = 10 : i32, message = "bqd,bkd->bqk"}> : () -> ()
    %cst_21 = arith.constant dense<0.000000e+00> : vector<2x8x8xf32>
    %46 = tpu.matmul %43, %44, %cst_21 {dimension_numbers = #tpu.dot_dimension_numbers<[2], [2], [1], [1], [0, 0, 0, 1, 1, 1], [0], [0]>} : vector<2x8x8xf32>, vector<2x8x8xf32>, vector<2x8x8xf32> -> vector<2x8x8xf32>
    "tpu.trace_stop"() : () -> ()
    %cst_22 = arith.constant 0.353553385 : f32
    %47 = vector.broadcast %cst_22 : f32 to vector<2x8x8xf32>
    %48 = arith.mulf %46, %47 : vector<2x8x8xf32>
    %cst_23 = arith.constant dense<0xFF800000> : vector<2x8xf32>
    %49 = vector.multi_reduction <maximumf>, %48, %cst_23 [2] : vector<2x8x8xf32> to vector<2x8xf32>
    %50 = vector.shape_cast %49 : vector<2x8xf32> to vector<2x8x1xf32>
    %51 = vector.broadcast %50 : vector<2x8x1xf32> to vector<2x8x8xf32>
    %52 = arith.subf %48, %51 : vector<2x8x8xf32>
    %53 = math.exp %52 : vector<2x8x8xf32>
    %cst_24 = arith.constant dense<0.000000e+00> : vector<2x8xf32>
    %54 = vector.multi_reduction <add>, %53, %cst_24 [2] : vector<2x8x8xf32> to vector<2x8xf32>
    %55 = vector.shape_cast %54 : vector<2x8xf32> to vector<2x8x1xf32>
    %56 = tpu.reciprocal %55 {approx = true} : vector<2x8x1xf32> -> vector<2x8x1xf32>
    %57 = vector.broadcast %56 : vector<2x8x1xf32> to vector<2x8x8xf32>
    %58 = arith.mulf %53, %57 : vector<2x8x8xf32>
    "tpu.trace_start"() <{level = 10 : i32, message = "bqk,bkd->bqd"}> : () -> ()
    %cst_25 = arith.constant dense<0.000000e+00> : vector<2x8x8xf32>
    %59 = tpu.matmul %58, %45, %cst_25 {dimension_numbers = #tpu.dot_dimension_numbers<[2], [1], [1], [2], [0, 0, 0, 1, 1, 2], [0], [0]>} : vector<2x8x8xf32>, vector<2x8x8xf32>, vector<2x8x8xf32> -> vector<2x8x8xf32>
    "tpu.trace_stop"() : () -> ()
    %60 = vector.shape_cast %59 : vector<2x8x8xf32> to vector<16x8xf32>
    %61 = vector.extract_strided_slice %41 {offsets = [0, 0], sizes = [8, 32], strides = [1, 1]} : vector<32x32xf32> to vector<8x32xf32>
    %cst_26 = arith.constant dense<0.000000e+00> : vector<16x32xf32>
    %62 = tpu.matmul %60, %61, %cst_26 {dimension_numbers = #tpu.dot_dimension_numbers<[1], [0], [0], [1], [0, 0, 1, 1], [], []>} : vector<16x8xf32>, vector<8x32xf32>, vector<16x32xf32> -> vector<16x32xf32>
    %63 = arith.addf %42, %62 : vector<16x32xf32>
    %64 = vector.extract_strided_slice %35 {offsets = [0, 0, 8], sizes = [2, 8, 8], strides = [1, 1, 1]} : vector<2x8x32xf32> to vector<2x8x8xf32>
    %65 = vector.extract_strided_slice %37 {offsets = [0, 0, 8], sizes = [2, 8, 8], strides = [1, 1, 1]} : vector<2x8x32xf32> to vector<2x8x8xf32>
    %66 = vector.extract_strided_slice %39 {offsets = [0, 0, 8], sizes = [2, 8, 8], strides = [1, 1, 1]} : vector<2x8x32xf32> to vector<2x8x8xf32>
    "tpu.trace_start"() <{level = 10 : i32, message = "bqd,bkd->bqk"}> : () -> ()
    %cst_27 = arith.constant dense<0.000000e+00> : vector<2x8x8xf32>
    %67 = tpu.matmul %64, %65, %cst_27 {dimension_numbers = #tpu.dot_dimension_numbers<[2], [2], [1], [1], [0, 0, 0, 1, 1, 1], [0], [0]>} : vector<2x8x8xf32>, vector<2x8x8xf32>, vector<2x8x8xf32> -> vector<2x8x8xf32>
    "tpu.trace_stop"() : () -> ()
    %cst_28 = arith.constant 0.353553385 : f32
    %68 = vector.broadcast %cst_28 : f32 to vector<2x8x8xf32>
    %69 = arith.mulf %67, %68 : vector<2x8x8xf32>
    %cst_29 = arith.constant dense<0xFF800000> : vector<2x8xf32>
    %70 = vector.multi_reduction <maximumf>, %69, %cst_29 [2] : vector<2x8x8xf32> to vector<2x8xf32>
    %71 = vector.shape_cast %70 : vector<2x8xf32> to vector<2x8x1xf32>
    %72 = vector.broadcast %71 : vector<2x8x1xf32> to vector<2x8x8xf32>
    %73 = arith.subf %69, %72 : vector<2x8x8xf32>
    %74 = math.exp %73 : vector<2x8x8xf32>
    %cst_30 = arith.constant dense<0.000000e+00> : vector<2x8xf32>
    %75 = vector.multi_reduction <add>, %74, %cst_30 [2] : vector<2x8x8xf32> to vector<2x8xf32>
    %76 = vector.shape_cast %75 : vector<2x8xf32> to vector<2x8x1xf32>
    %77 = tpu.reciprocal %76 {approx = true} : vector<2x8x1xf32> -> vector<2x8x1xf32>
    %78 = vector.broadcast %77 : vector<2x8x1xf32> to vector<2x8x8xf32>
    %79 = arith.mulf %74, %78 : vector<2x8x8xf32>
    "tpu.trace_start"() <{level = 10 : i32, message = "bqk,bkd->bqd"}> : () -> ()
    %cst_31 = arith.constant dense<0.000000e+00> : vector<2x8x8xf32>
    %80 = tpu.matmul %79, %66, %cst_31 {dimension_numbers = #tpu.dot_dimension_numbers<[2], [1], [1], [2], [0, 0, 0, 1, 1, 2], [0], [0]>} : vector<2x8x8xf32>, vector<2x8x8xf32>, vector<2x8x8xf32> -> vector<2x8x8xf32>
    "tpu.trace_stop"() : () -> ()
    %81 = vector.shape_cast %80 : vector<2x8x8xf32> to vector<16x8xf32>
    %82 = vector.extract_strided_slice %41 {offsets = [8, 0], sizes = [8, 32], strides = [1, 1]} : vector<32x32xf32> to vector<8x32xf32>
    %cst_32 = arith.constant dense<0.000000e+00> : vector<16x32xf32>
    %83 = tpu.matmul %81, %82, %cst_32 {dimension_numbers = #tpu.dot_dimension_numbers<[1], [0], [0], [1], [0, 0, 1, 1], [], []>} : vector<16x8xf32>, vector<8x32xf32>, vector<16x32xf32> -> vector<16x32xf32>
    %84 = arith.addf %63, %83 : vector<16x32xf32>
    %85 = vector.extract_strided_slice %35 {offsets = [0, 0, 16], sizes = [2, 8, 8], strides = [1, 1, 1]} : vector<2x8x32xf32> to vector<2x8x8xf32>
    %86 = vector.extract_strided_slice %37 {offsets = [0, 0, 16], sizes = [2, 8, 8], strides = [1, 1, 1]} : vector<2x8x32xf32> to vector<2x8x8xf32>
    %87 = vector.extract_strided_slice %39 {offsets = [0, 0, 16], sizes = [2, 8, 8], strides = [1, 1, 1]} : vector<2x8x32xf32> to vector<2x8x8xf32>
    "tpu.trace_start"() <{level = 10 : i32, message = "bqd,bkd->bqk"}> : () -> ()
    %cst_33 = arith.constant dense<0.000000e+00> : vector<2x8x8xf32>
    %88 = tpu.matmul %85, %86, %cst_33 {dimension_numbers = #tpu.dot_dimension_numbers<[2], [2], [1], [1], [0, 0, 0, 1, 1, 1], [0], [0]>} : vector<2x8x8xf32>, vector<2x8x8xf32>, vector<2x8x8xf32> -> vector<2x8x8xf32>
    "tpu.trace_stop"() : () -> ()
    %cst_34 = arith.constant 0.353553385 : f32
    %89 = vector.broadcast %cst_34 : f32 to vector<2x8x8xf32>
    %90 = arith.mulf %88, %89 : vector<2x8x8xf32>
    %cst_35 = arith.constant dense<0xFF800000> : vector<2x8xf32>
    %91 = vector.multi_reduction <maximumf>, %90, %cst_35 [2] : vector<2x8x8xf32> to vector<2x8xf32>
    %92 = vector.shape_cast %91 : vector<2x8xf32> to vector<2x8x1xf32>
    %93 = vector.broadcast %92 : vector<2x8x1xf32> to vector<2x8x8xf32>
    %94 = arith.subf %90, %93 : vector<2x8x8xf32>
    %95 = math.exp %94 : vector<2x8x8xf32>
    %cst_36 = arith.constant dense<0.000000e+00> : vector<2x8xf32>
    %96 = vector.multi_reduction <add>, %95, %cst_36 [2] : vector<2x8x8xf32> to vector<2x8xf32>
    %97 = vector.shape_cast %96 : vector<2x8xf32> to vector<2x8x1xf32>
    %98 = tpu.reciprocal %97 {approx = true} : vector<2x8x1xf32> -> vector<2x8x1xf32>
    %99 = vector.broadcast %98 : vector<2x8x1xf32> to vector<2x8x8xf32>
    %100 = arith.mulf %95, %99 : vector<2x8x8xf32>
    "tpu.trace_start"() <{level = 10 : i32, message = "bqk,bkd->bqd"}> : () -> ()
    %cst_37 = arith.constant dense<0.000000e+00> : vector<2x8x8xf32>
    %101 = tpu.matmul %100, %87, %cst_37 {dimension_numbers = #tpu.dot_dimension_numbers<[2], [1], [1], [2], [0, 0, 0, 1, 1, 2], [0], [0]>} : vector<2x8x8xf32>, vector<2x8x8xf32>, vector<2x8x8xf32> -> vector<2x8x8xf32>
    "tpu.trace_stop"() : () -> ()
    %102 = vector.shape_cast %101 : vector<2x8x8xf32> to vector<16x8xf32>
    %103 = vector.extract_strided_slice %41 {offsets = [16, 0], sizes = [8, 32], strides = [1, 1]} : vector<32x32xf32> to vector<8x32xf32>
    %cst_38 = arith.constant dense<0.000000e+00> : vector<16x32xf32>
    %104 = tpu.matmul %102, %103, %cst_38 {dimension_numbers = #tpu.dot_dimension_numbers<[1], [0], [0], [1], [0, 0, 1, 1], [], []>} : vector<16x8xf32>, vector<8x32xf32>, vector<16x32xf32> -> vector<16x32xf32>
    %105 = arith.addf %84, %104 : vector<16x32xf32>
    %106 = vector.extract_strided_slice %35 {offsets = [0, 0, 24], sizes = [2, 8, 8], strides = [1, 1, 1]} : vector<2x8x32xf32> to vector<2x8x8xf32>
    %107 = vector.extract_strided_slice %37 {offsets = [0, 0, 24], sizes = [2, 8, 8], strides = [1, 1, 1]} : vector<2x8x32xf32> to vector<2x8x8xf32>
    %108 = vector.extract_strided_slice %39 {offsets = [0, 0, 24], sizes = [2, 8, 8], strides = [1, 1, 1]} : vector<2x8x32xf32> to vector<2x8x8xf32>
    "tpu.trace_start"() <{level = 10 : i32, message = "bqd,bkd->bqk"}> : () -> ()
    %cst_39 = arith.constant dense<0.000000e+00> : vector<2x8x8xf32>
    %109 = tpu.matmul %106, %107, %cst_39 {dimension_numbers = #tpu.dot_dimension_numbers<[2], [2], [1], [1], [0, 0, 0, 1, 1, 1], [0], [0]>} : vector<2x8x8xf32>, vector<2x8x8xf32>, vector<2x8x8xf32> -> vector<2x8x8xf32>
    "tpu.trace_stop"() : () -> ()
    %cst_40 = arith.constant 0.353553385 : f32
    %110 = vector.broadcast %cst_40 : f32 to vector<2x8x8xf32>
    %111 = arith.mulf %109, %110 : vector<2x8x8xf32>
    %cst_41 = arith.constant dense<0xFF800000> : vector<2x8xf32>
    %112 = vector.multi_reduction <maximumf>, %111, %cst_41 [2] : vector<2x8x8xf32> to vector<2x8xf32>
    %113 = vector.shape_cast %112 : vector<2x8xf32> to vector<2x8x1xf32>
    %114 = vector.broadcast %113 : vector<2x8x1xf32> to vector<2x8x8xf32>
    %115 = arith.subf %111, %114 : vector<2x8x8xf32>
    %116 = math.exp %115 : vector<2x8x8xf32>
    %cst_42 = arith.constant dense<0.000000e+00> : vector<2x8xf32>
    %117 = vector.multi_reduction <add>, %116, %cst_42 [2] : vector<2x8x8xf32> to vector<2x8xf32>
    %118 = vector.shape_cast %117 : vector<2x8xf32> to vector<2x8x1xf32>
    %119 = tpu.reciprocal %118 {approx = true} : vector<2x8x1xf32> -> vector<2x8x1xf32>
    %120 = vector.broadcast %119 : vector<2x8x1xf32> to vector<2x8x8xf32>
    %121 = arith.mulf %116, %120 : vector<2x8x8xf32>
    "tpu.trace_start"() <{level = 10 : i32, message = "bqk,bkd->bqd"}> : () -> ()
    %cst_43 = arith.constant dense<0.000000e+00> : vector<2x8x8xf32>
    %122 = tpu.matmul %121, %108, %cst_43 {dimension_numbers = #tpu.dot_dimension_numbers<[2], [1], [1], [2], [0, 0, 0, 1, 1, 2], [0], [0]>} : vector<2x8x8xf32>, vector<2x8x8xf32>, vector<2x8x8xf32> -> vector<2x8x8xf32>
    "tpu.trace_stop"() : () -> ()
    %123 = vector.shape_cast %122 : vector<2x8x8xf32> to vector<16x8xf32>
    %124 = vector.extract_strided_slice %41 {offsets = [24, 0], sizes = [8, 32], strides = [1, 1]} : vector<32x32xf32> to vector<8x32xf32>
    %cst_44 = arith.constant dense<0.000000e+00> : vector<16x32xf32>
    %125 = tpu.matmul %123, %124, %cst_44 {dimension_numbers = #tpu.dot_dimension_numbers<[1], [0], [0], [1], [0, 0, 1, 1], [], []>} : vector<16x8xf32>, vector<8x32xf32>, vector<16x32xf32> -> vector<16x32xf32>
    %126 = arith.addf %105, %125 : vector<16x32xf32>
    %c0_45 = arith.constant 0 : index
    %c0_46 = arith.constant 0 : index
    %c0_47 = arith.constant 0 : index
    %127 = vector.load %arg6[%c0_45, %c0_46, %c0_47] : memref<2x1x32xf32, #tpu.memory_space<vmem>>, vector<1x1x32xf32>
    %128 = vector.shape_cast %127 : vector<1x1x32xf32> to vector<1x32xf32>
    %129 = vector.broadcast %128 : vector<1x32xf32> to vector<16x32xf32>
    %130 = arith.addf %126, %129 : vector<16x32xf32>
    %131 = arith.addf %25, %130 : vector<16x32xf32>
    %c0_48 = arith.constant 0 : index
    %c0_49 = arith.constant 0 : index
    %c0_50 = arith.constant 0 : index
    %132 = vector.load %arg7[%c0_48, %c0_49, %c0_50] : memref<2x1x32xf32, #tpu.memory_space<vmem>>, vector<1x1x32xf32>
    %133 = vector.shape_cast %132 : vector<1x1x32xf32> to vector<1x32xf32>
    %c0_51 = arith.constant 0 : index
    %c0_52 = arith.constant 0 : index
    %c0_53 = arith.constant 0 : index
    %134 = vector.load %arg8[%c0_51, %c0_52, %c0_53] : memref<2x1x32xf32, #tpu.memory_space<vmem>>, vector<1x1x32xf32>
    %135 = vector.shape_cast %134 : vector<1x1x32xf32> to vector<1x32xf32>
    %cst_54 = arith.constant dense<0.000000e+00> : vector<16xf32>
    %136 = vector.multi_reduction <add>, %131, %cst_54 [1] : vector<16x32xf32> to vector<16xf32>
    %137 = vector.shape_cast %136 : vector<16xf32> to vector<16x1xf32>
    %cst_55 = arith.constant 3.200000e+01 : f32
    %138 = vector.broadcast %cst_55 : f32 to vector<16x1xf32>
    %139 = arith.divf %137, %138 : vector<16x1xf32>
    %140 = vector.broadcast %139 : vector<16x1xf32> to vector<16x32xf32>
    %141 = arith.subf %131, %140 : vector<16x32xf32>
    %142 = arith.mulf %141, %141 : vector<16x32xf32>
    %cst_56 = arith.constant dense<0.000000e+00> : vector<16xf32>
    %143 = vector.multi_reduction <add>, %142, %cst_56 [1] : vector<16x32xf32> to vector<16xf32>
    %144 = vector.shape_cast %143 : vector<16xf32> to vector<16x1xf32>
    %cst_57 = arith.constant 3.200000e+01 : f32
    %145 = vector.broadcast %cst_57 : f32 to vector<16x1xf32>
    %146 = arith.divf %144, %145 : vector<16x1xf32>
    %147 = vector.broadcast %139 : vector<16x1xf32> to vector<16x32xf32>
    %148 = arith.subf %131, %147 : vector<16x32xf32>
    %cst_58 = arith.constant 9.99999996E-13 : f32
    %149 = vector.broadcast %cst_58 : f32 to vector<16x1xf32>
    %150 = arith.addf %146, %149 : vector<16x1xf32>
    %151 = math.rsqrt %150 : vector<16x1xf32>
    %152 = vector.broadcast %151 : vector<16x1xf32> to vector<16x32xf32>
    %153 = arith.mulf %148, %152 : vector<16x32xf32>
    %154 = vector.broadcast %133 : vector<1x32xf32> to vector<16x32xf32>
    %155 = arith.mulf %153, %154 : vector<16x32xf32>
    %156 = vector.broadcast %135 : vector<1x32xf32> to vector<16x32xf32>
    %157 = arith.addf %155, %156 : vector<16x32xf32>
    %158 = arith.truncf %157 : vector<16x32xf32> to vector<16x32xbf16>
    %c0_59 = arith.constant 0 : index
    %c0_60 = arith.constant 0 : index
    %c0_61 = arith.constant 0 : index
    %159 = vector.load %arg9[%c0_59, %c0_60, %c0_61] : memref<2x32x64xbf16, #tpu.memory_space<vmem>>, vector<1x32x64xbf16>
    %160 = vector.shape_cast %159 : vector<1x32x64xbf16> to vector<32x64xbf16>
    %cst_62 = arith.constant dense<0.000000e+00> : vector<16x64xf32>
    %161 = tpu.matmul %158, %160, %cst_62 {dimension_numbers = #tpu.dot_dimension_numbers<[1], [0], [0], [1], [0, 0, 1, 1], [], []>} : vector<16x32xbf16>, vector<32x64xbf16>, vector<16x64xf32> -> vector<16x64xf32>
    %c0_63 = arith.constant 0 : index
    %c0_64 = arith.constant 0 : index
    %c0_65 = arith.constant 0 : index
    %162 = vector.load %arg10[%c0_63, %c0_64, %c0_65] : memref<2x1x64xf32, #tpu.memory_space<vmem>>, vector<1x1x64xf32>
    %163 = vector.shape_cast %162 : vector<1x1x64xf32> to vector<1x64xf32>
    %164 = vector.broadcast %163 : vector<1x64xf32> to vector<16x64xf32>
    %165 = arith.addf %161, %164 : vector<16x64xf32>
    %cst_66 = arith.constant 5.000000e-01 : f32
    %166 = vector.broadcast %cst_66 : f32 to vector<16x64xf32>
    %167 = arith.mulf %166, %165 : vector<16x64xf32>
    %cst_67 = arith.constant 4.471500e-02 : f32
    %168 = vector.broadcast %cst_67 : f32 to vector<16x64xf32>
    %169 = arith.mulf %168, %165 : vector<16x64xf32>
    %170 = arith.mulf %169, %165 : vector<16x64xf32>
    %171 = arith.mulf %170, %165 : vector<16x64xf32>
    %172 = arith.addf %165, %171 : vector<16x64xf32>
    %cst_68 = arith.constant 0.797884583 : f32
    %173 = vector.broadcast %cst_68 : f32 to vector<16x64xf32>
    %174 = arith.mulf %173, %172 : vector<16x64xf32>
    %175 = math.tanh %174 : vector<16x64xf32>
    %cst_69 = arith.constant 1.000000e+00 : f32
    %176 = vector.broadcast %cst_69 : f32 to vector<16x64xf32>
    %177 = arith.addf %176, %175 : vector<16x64xf32>
    %178 = arith.mulf %167, %177 : vector<16x64xf32>
    %179 = arith.truncf %178 : vector<16x64xf32> to vector<16x64xbf16>
    %c0_70 = arith.constant 0 : index
    %c0_71 = arith.constant 0 : index
    %c0_72 = arith.constant 0 : index
    %180 = vector.load %arg11[%c0_70, %c0_71, %c0_72] : memref<2x64x32xbf16, #tpu.memory_space<vmem>>, vector<1x64x32xbf16>
    %181 = vector.shape_cast %180 : vector<1x64x32xbf16> to vector<64x32xbf16>
    %cst_73 = arith.constant dense<0.000000e+00> : vector<16x32xf32>
    %182 = tpu.matmul %179, %181, %cst_73 {dimension_numbers = #tpu.dot_dimension_numbers<[1], [0], [0], [1], [0, 0, 1, 1], [], []>} : vector<16x64xbf16>, vector<64x32xbf16>, vector<16x32xf32> -> vector<16x32xf32>
    %c0_74 = arith.constant 0 : index
    %c0_75 = arith.constant 0 : index
    %c0_76 = arith.constant 0 : index
    %183 = vector.load %arg12[%c0_74, %c0_75, %c0_76] : memref<2x1x32xf32, #tpu.memory_space<vmem>>, vector<1x1x32xf32>
    %184 = vector.shape_cast %183 : vector<1x1x32xf32> to vector<1x32xf32>
    %185 = vector.broadcast %184 : vector<1x32xf32> to vector<16x32xf32>
    %186 = arith.addf %182, %185 : vector<16x32xf32>
    %187 = arith.addf %157, %186 : vector<16x32xf32>
    %c0_77 = arith.constant 0 : index
    %c0_78 = arith.constant 0 : index
    %c0_79 = arith.constant 0 : index
    %188 = vector.load %arg13[%c0_77, %c0_78, %c0_79] : memref<2x1x32xf32, #tpu.memory_space<vmem>>, vector<1x1x32xf32>
    %189 = vector.shape_cast %188 : vector<1x1x32xf32> to vector<1x32xf32>
    %c0_80 = arith.constant 0 : index
    %c0_81 = arith.constant 0 : index
    %c0_82 = arith.constant 0 : index
    %190 = vector.load %arg14[%c0_80, %c0_81, %c0_82] : memref<2x1x32xf32, #tpu.memory_space<vmem>>, vector<1x1x32xf32>
    %191 = vector.shape_cast %190 : vector<1x1x32xf32> to vector<1x32xf32>
    %cst_83 = arith.constant dense<0.000000e+00> : vector<16xf32>
    %192 = vector.multi_reduction <add>, %187, %cst_83 [1] : vector<16x32xf32> to vector<16xf32>
    %193 = vector.shape_cast %192 : vector<16xf32> to vector<16x1xf32>
    %cst_84 = arith.constant 3.200000e+01 : f32
    %194 = vector.broadcast %cst_84 : f32 to vector<16x1xf32>
    %195 = arith.divf %193, %194 : vector<16x1xf32>
    %196 = vector.broadcast %195 : vector<16x1xf32> to vector<16x32xf32>
    %197 = arith.subf %187, %196 : vector<16x32xf32>
    %198 = arith.mulf %197, %197 : vector<16x32xf32>
    %cst_85 = arith.constant dense<0.000000e+00> : vector<16xf32>
    %199 = vector.multi_reduction <add>, %198, %cst_85 [1] : vector<16x32xf32> to vector<16xf32>
    %200 = vector.shape_cast %199 : vector<16xf32> to vector<16x1xf32>
    %cst_86 = arith.constant 3.200000e+01 : f32
    %201 = vector.broadcast %cst_86 : f32 to vector<16x1xf32>
    %202 = arith.divf %200, %201 : vector<16x1xf32>
    %203 = vector.broadcast %195 : vector<16x1xf32> to vector<16x32xf32>
    %204 = arith.subf %187, %203 : vector<16x32xf32>
    %cst_87 = arith.constant 9.99999996E-13 : f32
    %205 = vector.broadcast %cst_87 : f32 to vector<16x1xf32>
    %206 = arith.addf %202, %205 : vector<16x1xf32>
    %207 = math.rsqrt %206 : vector<16x1xf32>
    %208 = vector.broadcast %207 : vector<16x1xf32> to vector<16x32xf32>
    %209 = arith.mulf %204, %208 : vector<16x32xf32>
    %210 = vector.broadcast %189 : vector<1x32xf32> to vector<16x32xf32>
    %211 = arith.mulf %209, %210 : vector<16x32xf32>
    %212 = vector.broadcast %191 : vector<1x32xf32> to vector<16x32xf32>
    %213 = arith.addf %211, %212 : vector<16x32xf32>
    %214 = arith.truncf %213 : vector<16x32xf32> to vector<16x32xbf16>
    %c1 = arith.constant 1 : index
    %c0_88 = arith.constant 0 : index
    %c0_89 = arith.constant 0 : index
    %215 = vector.load %arg3[%c1, %c0_88, %c0_89] : memref<2x32x96xbf16, #tpu.memory_space<vmem>>, vector<1x32x96xbf16>
    %216 = vector.shape_cast %215 : vector<1x32x96xbf16> to vector<32x96xbf16>
    %cst_90 = arith.constant dense<0.000000e+00> : vector<16x96xf32>
    %217 = tpu.matmul %214, %216, %cst_90 {dimension_numbers = #tpu.dot_dimension_numbers<[1], [0], [0], [1], [0, 0, 1, 1], [], []>} : vector<16x32xbf16>, vector<32x96xbf16>, vector<16x96xf32> -> vector<16x96xf32>
    %c1_91 = arith.constant 1 : index
    %c0_92 = arith.constant 0 : index
    %c0_93 = arith.constant 0 : index
    %218 = vector.load %arg4[%c1_91, %c0_92, %c0_93] : memref<2x1x96xf32, #tpu.memory_space<vmem>>, vector<1x1x96xf32>
    %219 = vector.shape_cast %218 : vector<1x1x96xf32> to vector<1x96xf32>
    %220 = vector.broadcast %219 : vector<1x96xf32> to vector<16x96xf32>
    %221 = arith.addf %217, %220 : vector<16x96xf32>
    %222 = vector.extract_strided_slice %221 {offsets = [0, 0], sizes = [16, 32], strides = [1, 1]} : vector<16x96xf32> to vector<16x32xf32>
    %223 = vector.shape_cast %222 : vector<16x32xf32> to vector<2x8x32xf32>
    %224 = vector.extract_strided_slice %221 {offsets = [0, 32], sizes = [16, 32], strides = [1, 1]} : vector<16x96xf32> to vector<16x32xf32>
    %225 = vector.shape_cast %224 : vector<16x32xf32> to vector<2x8x32xf32>
    %226 = vector.extract_strided_slice %221 {offsets = [0, 64], sizes = [16, 32], strides = [1, 1]} : vector<16x96xf32> to vector<16x32xf32>
    %227 = vector.shape_cast %226 : vector<16x32xf32> to vector<2x8x32xf32>
    %c1_94 = arith.constant 1 : index
    %c0_95 = arith.constant 0 : index
    %c0_96 = arith.constant 0 : index
    %228 = vector.load %arg5[%c1_94, %c0_95, %c0_96] : memref<2x32x32xf32, #tpu.memory_space<vmem>>, vector<1x32x32xf32>
    %229 = vector.shape_cast %228 : vector<1x32x32xf32> to vector<32x32xf32>
    %cst_97 = arith.constant 0.000000e+00 : f32
    %230 = vector.broadcast %cst_97 : f32 to vector<16x32xf32>
    %231 = vector.extract_strided_slice %223 {offsets = [0, 0, 0], sizes = [2, 8, 8], strides = [1, 1, 1]} : vector<2x8x32xf32> to vector<2x8x8xf32>
    %232 = vector.extract_strided_slice %225 {offsets = [0, 0, 0], sizes = [2, 8, 8], strides = [1, 1, 1]} : vector<2x8x32xf32> to vector<2x8x8xf32>
    %233 = vector.extract_strided_slice %227 {offsets = [0, 0, 0], sizes = [2, 8, 8], strides = [1, 1, 1]} : vector<2x8x32xf32> to vector<2x8x8xf32>
    "tpu.trace_start"() <{level = 10 : i32, message = "bqd,bkd->bqk"}> : () -> ()
    %cst_98 = arith.constant dense<0.000000e+00> : vector<2x8x8xf32>
    %234 = tpu.matmul %231, %232, %cst_98 {dimension_numbers = #tpu.dot_dimension_numbers<[2], [2], [1], [1], [0, 0, 0, 1, 1, 1], [0], [0]>} : vector<2x8x8xf32>, vector<2x8x8xf32>, vector<2x8x8xf32> -> vector<2x8x8xf32>
    "tpu.trace_stop"() : () -> ()
    %cst_99 = arith.constant 0.353553385 : f32
    %235 = vector.broadcast %cst_99 : f32 to vector<2x8x8xf32>
    %236 = arith.mulf %234, %235 : vector<2x8x8xf32>
    %cst_100 = arith.constant dense<0xFF800000> : vector<2x8xf32>
    %237 = vector.multi_reduction <maximumf>, %236, %cst_100 [2] : vector<2x8x8xf32> to vector<2x8xf32>
    %238 = vector.shape_cast %237 : vector<2x8xf32> to vector<2x8x1xf32>
    %239 = vector.broadcast %238 : vector<2x8x1xf32> to vector<2x8x8xf32>
    %240 = arith.subf %236, %239 : vector<2x8x8xf32>
    %241 = math.exp %240 : vector<2x8x8xf32>
    %cst_101 = arith.constant dense<0.000000e+00> : vector<2x8xf32>
    %242 = vector.multi_reduction <add>, %241, %cst_101 [2] : vector<2x8x8xf32> to vector<2x8xf32>
    %243 = vector.shape_cast %242 : vector<2x8xf32> to vector<2x8x1xf32>
    %244 = tpu.reciprocal %243 {approx = true} : vector<2x8x1xf32> -> vector<2x8x1xf32>
    %245 = vector.broadcast %244 : vector<2x8x1xf32> to vector<2x8x8xf32>
    %246 = arith.mulf %241, %245 : vector<2x8x8xf32>
    "tpu.trace_start"() <{level = 10 : i32, message = "bqk,bkd->bqd"}> : () -> ()
    %cst_102 = arith.constant dense<0.000000e+00> : vector<2x8x8xf32>
    %247 = tpu.matmul %246, %233, %cst_102 {dimension_numbers = #tpu.dot_dimension_numbers<[2], [1], [1], [2], [0, 0, 0, 1, 1, 2], [0], [0]>} : vector<2x8x8xf32>, vector<2x8x8xf32>, vector<2x8x8xf32> -> vector<2x8x8xf32>
    "tpu.trace_stop"() : () -> ()
    %248 = vector.shape_cast %247 : vector<2x8x8xf32> to vector<16x8xf32>
    %249 = vector.extract_strided_slice %229 {offsets = [0, 0], sizes = [8, 32], strides = [1, 1]} : vector<32x32xf32> to vector<8x32xf32>
    %cst_103 = arith.constant dense<0.000000e+00> : vector<16x32xf32>
    %250 = tpu.matmul %248, %249, %cst_103 {dimension_numbers = #tpu.dot_dimension_numbers<[1], [0], [0], [1], [0, 0, 1, 1], [], []>} : vector<16x8xf32>, vector<8x32xf32>, vector<16x32xf32> -> vector<16x32xf32>
    %251 = arith.addf %230, %250 : vector<16x32xf32>
    %252 = vector.extract_strided_slice %223 {offsets = [0, 0, 8], sizes = [2, 8, 8], strides = [1, 1, 1]} : vector<2x8x32xf32> to vector<2x8x8xf32>
    %253 = vector.extract_strided_slice %225 {offsets = [0, 0, 8], sizes = [2, 8, 8], strides = [1, 1, 1]} : vector<2x8x32xf32> to vector<2x8x8xf32>
    %254 = vector.extract_strided_slice %227 {offsets = [0, 0, 8], sizes = [2, 8, 8], strides = [1, 1, 1]} : vector<2x8x32xf32> to vector<2x8x8xf32>
    "tpu.trace_start"() <{level = 10 : i32, message = "bqd,bkd->bqk"}> : () -> ()
    %cst_104 = arith.constant dense<0.000000e+00> : vector<2x8x8xf32>
    %255 = tpu.matmul %252, %253, %cst_104 {dimension_numbers = #tpu.dot_dimension_numbers<[2], [2], [1], [1], [0, 0, 0, 1, 1, 1], [0], [0]>} : vector<2x8x8xf32>, vector<2x8x8xf32>, vector<2x8x8xf32> -> vector<2x8x8xf32>
    "tpu.trace_stop"() : () -> ()
    %cst_105 = arith.constant 0.353553385 : f32
    %256 = vector.broadcast %cst_105 : f32 to vector<2x8x8xf32>
    %257 = arith.mulf %255, %256 : vector<2x8x8xf32>
    %cst_106 = arith.constant dense<0xFF800000> : vector<2x8xf32>
    %258 = vector.multi_reduction <maximumf>, %257, %cst_106 [2] : vector<2x8x8xf32> to vector<2x8xf32>
    %259 = vector.shape_cast %258 : vector<2x8xf32> to vector<2x8x1xf32>
    %260 = vector.broadcast %259 : vector<2x8x1xf32> to vector<2x8x8xf32>
    %261 = arith.subf %257, %260 : vector<2x8x8xf32>
    %262 = math.exp %261 : vector<2x8x8xf32>
    %cst_107 = arith.constant dense<0.000000e+00> : vector<2x8xf32>
    %263 = vector.multi_reduction <add>, %262, %cst_107 [2] : vector<2x8x8xf32> to vector<2x8xf32>
    %264 = vector.shape_cast %263 : vector<2x8xf32> to vector<2x8x1xf32>
    %265 = tpu.reciprocal %264 {approx = true} : vector<2x8x1xf32> -> vector<2x8x1xf32>
    %266 = vector.broadcast %265 : vector<2x8x1xf32> to vector<2x8x8xf32>
    %267 = arith.mulf %262, %266 : vector<2x8x8xf32>
    "tpu.trace_start"() <{level = 10 : i32, message = "bqk,bkd->bqd"}> : () -> ()
    %cst_108 = arith.constant dense<0.000000e+00> : vector<2x8x8xf32>
    %268 = tpu.matmul %267, %254, %cst_108 {dimension_numbers = #tpu.dot_dimension_numbers<[2], [1], [1], [2], [0, 0, 0, 1, 1, 2], [0], [0]>} : vector<2x8x8xf32>, vector<2x8x8xf32>, vector<2x8x8xf32> -> vector<2x8x8xf32>
    "tpu.trace_stop"() : () -> ()
    %269 = vector.shape_cast %268 : vector<2x8x8xf32> to vector<16x8xf32>
    %270 = vector.extract_strided_slice %229 {offsets = [8, 0], sizes = [8, 32], strides = [1, 1]} : vector<32x32xf32> to vector<8x32xf32>
    %cst_109 = arith.constant dense<0.000000e+00> : vector<16x32xf32>
    %271 = tpu.matmul %269, %270, %cst_109 {dimension_numbers = #tpu.dot_dimension_numbers<[1], [0], [0], [1], [0, 0, 1, 1], [], []>} : vector<16x8xf32>, vector<8x32xf32>, vector<16x32xf32> -> vector<16x32xf32>
    %272 = arith.addf %251, %271 : vector<16x32xf32>
    %273 = vector.extract_strided_slice %223 {offsets = [0, 0, 16], sizes = [2, 8, 8], strides = [1, 1, 1]} : vector<2x8x32xf32> to vector<2x8x8xf32>
    %274 = vector.extract_strided_slice %225 {offsets = [0, 0, 16], sizes = [2, 8, 8], strides = [1, 1, 1]} : vector<2x8x32xf32> to vector<2x8x8xf32>
    %275 = vector.extract_strided_slice %227 {offsets = [0, 0, 16], sizes = [2, 8, 8], strides = [1, 1, 1]} : vector<2x8x32xf32> to vector<2x8x8xf32>
    "tpu.trace_start"() <{level = 10 : i32, message = "bqd,bkd->bqk"}> : () -> ()
    %cst_110 = arith.constant dense<0.000000e+00> : vector<2x8x8xf32>
    %276 = tpu.matmul %273, %274, %cst_110 {dimension_numbers = #tpu.dot_dimension_numbers<[2], [2], [1], [1], [0, 0, 0, 1, 1, 1], [0], [0]>} : vector<2x8x8xf32>, vector<2x8x8xf32>, vector<2x8x8xf32> -> vector<2x8x8xf32>
    "tpu.trace_stop"() : () -> ()
    %cst_111 = arith.constant 0.353553385 : f32
    %277 = vector.broadcast %cst_111 : f32 to vector<2x8x8xf32>
    %278 = arith.mulf %276, %277 : vector<2x8x8xf32>
    %cst_112 = arith.constant dense<0xFF800000> : vector<2x8xf32>
    %279 = vector.multi_reduction <maximumf>, %278, %cst_112 [2] : vector<2x8x8xf32> to vector<2x8xf32>
    %280 = vector.shape_cast %279 : vector<2x8xf32> to vector<2x8x1xf32>
    %281 = vector.broadcast %280 : vector<2x8x1xf32> to vector<2x8x8xf32>
    %282 = arith.subf %278, %281 : vector<2x8x8xf32>
    %283 = math.exp %282 : vector<2x8x8xf32>
    %cst_113 = arith.constant dense<0.000000e+00> : vector<2x8xf32>
    %284 = vector.multi_reduction <add>, %283, %cst_113 [2] : vector<2x8x8xf32> to vector<2x8xf32>
    %285 = vector.shape_cast %284 : vector<2x8xf32> to vector<2x8x1xf32>
    %286 = tpu.reciprocal %285 {approx = true} : vector<2x8x1xf32> -> vector<2x8x1xf32>
    %287 = vector.broadcast %286 : vector<2x8x1xf32> to vector<2x8x8xf32>
    %288 = arith.mulf %283, %287 : vector<2x8x8xf32>
    "tpu.trace_start"() <{level = 10 : i32, message = "bqk,bkd->bqd"}> : () -> ()
    %cst_114 = arith.constant dense<0.000000e+00> : vector<2x8x8xf32>
    %289 = tpu.matmul %288, %275, %cst_114 {dimension_numbers = #tpu.dot_dimension_numbers<[2], [1], [1], [2], [0, 0, 0, 1, 1, 2], [0], [0]>} : vector<2x8x8xf32>, vector<2x8x8xf32>, vector<2x8x8xf32> -> vector<2x8x8xf32>
    "tpu.trace_stop"() : () -> ()
    %290 = vector.shape_cast %289 : vector<2x8x8xf32> to vector<16x8xf32>
    %291 = vector.extract_strided_slice %229 {offsets = [16, 0], sizes = [8, 32], strides = [1, 1]} : vector<32x32xf32> to vector<8x32xf32>
    %cst_115 = arith.constant dense<0.000000e+00> : vector<16x32xf32>
    %292 = tpu.matmul %290, %291, %cst_115 {dimension_numbers = #tpu.dot_dimension_numbers<[1], [0], [0], [1], [0, 0, 1, 1], [], []>} : vector<16x8xf32>, vector<8x32xf32>, vector<16x32xf32> -> vector<16x32xf32>
    %293 = arith.addf %272, %292 : vector<16x32xf32>
    %294 = vector.extract_strided_slice %223 {offsets = [0, 0, 24], sizes = [2, 8, 8], strides = [1, 1, 1]} : vector<2x8x32xf32> to vector<2x8x8xf32>
    %295 = vector.extract_strided_slice %225 {offsets = [0, 0, 24], sizes = [2, 8, 8], strides = [1, 1, 1]} : vector<2x8x32xf32> to vector<2x8x8xf32>
    %296 = vector.extract_strided_slice %227 {offsets = [0, 0, 24], sizes = [2, 8, 8], strides = [1, 1, 1]} : vector<2x8x32xf32> to vector<2x8x8xf32>
    "tpu.trace_start"() <{level = 10 : i32, message = "bqd,bkd->bqk"}> : () -> ()
    %cst_116 = arith.constant dense<0.000000e+00> : vector<2x8x8xf32>
    %297 = tpu.matmul %294, %295, %cst_116 {dimension_numbers = #tpu.dot_dimension_numbers<[2], [2], [1], [1], [0, 0, 0, 1, 1, 1], [0], [0]>} : vector<2x8x8xf32>, vector<2x8x8xf32>, vector<2x8x8xf32> -> vector<2x8x8xf32>
    "tpu.trace_stop"() : () -> ()
    %cst_117 = arith.constant 0.353553385 : f32
    %298 = vector.broadcast %cst_117 : f32 to vector<2x8x8xf32>
    %299 = arith.mulf %297, %298 : vector<2x8x8xf32>
    %cst_118 = arith.constant dense<0xFF800000> : vector<2x8xf32>
    %300 = vector.multi_reduction <maximumf>, %299, %cst_118 [2] : vector<2x8x8xf32> to vector<2x8xf32>
    %301 = vector.shape_cast %300 : vector<2x8xf32> to vector<2x8x1xf32>
    %302 = vector.broadcast %301 : vector<2x8x1xf32> to vector<2x8x8xf32>
    %303 = arith.subf %299, %302 : vector<2x8x8xf32>
    %304 = math.exp %303 : vector<2x8x8xf32>
    %cst_119 = arith.constant dense<0.000000e+00> : vector<2x8xf32>
    %305 = vector.multi_reduction <add>, %304, %cst_119 [2] : vector<2x8x8xf32> to vector<2x8xf32>
    %306 = vector.shape_cast %305 : vector<2x8xf32> to vector<2x8x1xf32>
    %307 = tpu.reciprocal %306 {approx = true} : vector<2x8x1xf32> -> vector<2x8x1xf32>
    %308 = vector.broadcast %307 : vector<2x8x1xf32> to vector<2x8x8xf32>
    %309 = arith.mulf %304, %308 : vector<2x8x8xf32>
    "tpu.trace_start"() <{level = 10 : i32, message = "bqk,bkd->bqd"}> : () -> ()
    %cst_120 = arith.constant dense<0.000000e+00> : vector<2x8x8xf32>
    %310 = tpu.matmul %309, %296, %cst_120 {dimension_numbers = #tpu.dot_dimension_numbers<[2], [1], [1], [2], [0, 0, 0, 1, 1, 2], [0], [0]>} : vector<2x8x8xf32>, vector<2x8x8xf32>, vector<2x8x8xf32> -> vector<2x8x8xf32>
    "tpu.trace_stop"() : () -> ()
    %311 = vector.shape_cast %310 : vector<2x8x8xf32> to vector<16x8xf32>
    %312 = vector.extract_strided_slice %229 {offsets = [24, 0], sizes = [8, 32], strides = [1, 1]} : vector<32x32xf32> to vector<8x32xf32>
    %cst_121 = arith.constant dense<0.000000e+00> : vector<16x32xf32>
    %313 = tpu.matmul %311, %312, %cst_121 {dimension_numbers = #tpu.dot_dimension_numbers<[1], [0], [0], [1], [0, 0, 1, 1], [], []>} : vector<16x8xf32>, vector<8x32xf32>, vector<16x32xf32> -> vector<16x32xf32>
    %314 = arith.addf %293, %313 : vector<16x32xf32>
    %c1_122 = arith.constant 1 : index
    %c0_123 = arith.constant 0 : index
    %c0_124 = arith.constant 0 : index
    %315 = vector.load %arg6[%c1_122, %c0_123, %c0_124] : memref<2x1x32xf32, #tpu.memory_space<vmem>>, vector<1x1x32xf32>
    %316 = vector.shape_cast %315 : vector<1x1x32xf32> to vector<1x32xf32>
    %317 = vector.broadcast %316 : vector<1x32xf32> to vector<16x32xf32>
    %318 = arith.addf %314, %317 : vector<16x32xf32>
    %319 = arith.addf %213, %318 : vector<16x32xf32>
    %c1_125 = arith.constant 1 : index
    %c0_126 = arith.constant 0 : index
    %c0_127 = arith.constant 0 : index
    %320 = vector.load %arg7[%c1_125, %c0_126, %c0_127] : memref<2x1x32xf32, #tpu.memory_space<vmem>>, vector<1x1x32xf32>
    %321 = vector.shape_cast %320 : vector<1x1x32xf32> to vector<1x32xf32>
    %c1_128 = arith.constant 1 : index
    %c0_129 = arith.constant 0 : index
    %c0_130 = arith.constant 0 : index
    %322 = vector.load %arg8[%c1_128, %c0_129, %c0_130] : memref<2x1x32xf32, #tpu.memory_space<vmem>>, vector<1x1x32xf32>
    %323 = vector.shape_cast %322 : vector<1x1x32xf32> to vector<1x32xf32>
    %cst_131 = arith.constant dense<0.000000e+00> : vector<16xf32>
    %324 = vector.multi_reduction <add>, %319, %cst_131 [1] : vector<16x32xf32> to vector<16xf32>
    %325 = vector.shape_cast %324 : vector<16xf32> to vector<16x1xf32>
    %cst_132 = arith.constant 3.200000e+01 : f32
    %326 = vector.broadcast %cst_132 : f32 to vector<16x1xf32>
    %327 = arith.divf %325, %326 : vector<16x1xf32>
    %328 = vector.broadcast %327 : vector<16x1xf32> to vector<16x32xf32>
    %329 = arith.subf %319, %328 : vector<16x32xf32>
    %330 = arith.mulf %329, %329 : vector<16x32xf32>
    %cst_133 = arith.constant dense<0.000000e+00> : vector<16xf32>
    %331 = vector.multi_reduction <add>, %330, %cst_133 [1] : vector<16x32xf32> to vector<16xf32>
    %332 = vector.shape_cast %331 : vector<16xf32> to vector<16x1xf32>
    %cst_134 = arith.constant 3.200000e+01 : f32
    %333 = vector.broadcast %cst_134 : f32 to vector<16x1xf32>
    %334 = arith.divf %332, %333 : vector<16x1xf32>
    %335 = vector.broadcast %327 : vector<16x1xf32> to vector<16x32xf32>
    %336 = arith.subf %319, %335 : vector<16x32xf32>
    %cst_135 = arith.constant 9.99999996E-13 : f32
    %337 = vector.broadcast %cst_135 : f32 to vector<16x1xf32>
    %338 = arith.addf %334, %337 : vector<16x1xf32>
    %339 = math.rsqrt %338 : vector<16x1xf32>
    %340 = vector.broadcast %339 : vector<16x1xf32> to vector<16x32xf32>
    %341 = arith.mulf %336, %340 : vector<16x32xf32>
    %342 = vector.broadcast %321 : vector<1x32xf32> to vector<16x32xf32>
    %343 = arith.mulf %341, %342 : vector<16x32xf32>
    %344 = vector.broadcast %323 : vector<1x32xf32> to vector<16x32xf32>
    %345 = arith.addf %343, %344 : vector<16x32xf32>
    %346 = arith.truncf %345 : vector<16x32xf32> to vector<16x32xbf16>
    %c1_136 = arith.constant 1 : index
    %c0_137 = arith.constant 0 : index
    %c0_138 = arith.constant 0 : index
    %347 = vector.load %arg9[%c1_136, %c0_137, %c0_138] : memref<2x32x64xbf16, #tpu.memory_space<vmem>>, vector<1x32x64xbf16>
    %348 = vector.shape_cast %347 : vector<1x32x64xbf16> to vector<32x64xbf16>
    %cst_139 = arith.constant dense<0.000000e+00> : vector<16x64xf32>
    %349 = tpu.matmul %346, %348, %cst_139 {dimension_numbers = #tpu.dot_dimension_numbers<[1], [0], [0], [1], [0, 0, 1, 1], [], []>} : vector<16x32xbf16>, vector<32x64xbf16>, vector<16x64xf32> -> vector<16x64xf32>
    %c1_140 = arith.constant 1 : index
    %c0_141 = arith.constant 0 : index
    %c0_142 = arith.constant 0 : index
    %350 = vector.load %arg10[%c1_140, %c0_141, %c0_142] : memref<2x1x64xf32, #tpu.memory_space<vmem>>, vector<1x1x64xf32>
    %351 = vector.shape_cast %350 : vector<1x1x64xf32> to vector<1x64xf32>
    %352 = vector.broadcast %351 : vector<1x64xf32> to vector<16x64xf32>
    %353 = arith.addf %349, %352 : vector<16x64xf32>
    %cst_143 = arith.constant 5.000000e-01 : f32
    %354 = vector.broadcast %cst_143 : f32 to vector<16x64xf32>
    %355 = arith.mulf %354, %353 : vector<16x64xf32>
    %cst_144 = arith.constant 4.471500e-02 : f32
    %356 = vector.broadcast %cst_144 : f32 to vector<16x64xf32>
    %357 = arith.mulf %356, %353 : vector<16x64xf32>
    %358 = arith.mulf %357, %353 : vector<16x64xf32>
    %359 = arith.mulf %358, %353 : vector<16x64xf32>
    %360 = arith.addf %353, %359 : vector<16x64xf32>
    %cst_145 = arith.constant 0.797884583 : f32
    %361 = vector.broadcast %cst_145 : f32 to vector<16x64xf32>
    %362 = arith.mulf %361, %360 : vector<16x64xf32>
    %363 = math.tanh %362 : vector<16x64xf32>
    %cst_146 = arith.constant 1.000000e+00 : f32
    %364 = vector.broadcast %cst_146 : f32 to vector<16x64xf32>
    %365 = arith.addf %364, %363 : vector<16x64xf32>
    %366 = arith.mulf %355, %365 : vector<16x64xf32>
    %367 = arith.truncf %366 : vector<16x64xf32> to vector<16x64xbf16>
    %c1_147 = arith.constant 1 : index
    %c0_148 = arith.constant 0 : index
    %c0_149 = arith.constant 0 : index
    %368 = vector.load %arg11[%c1_147, %c0_148, %c0_149] : memref<2x64x32xbf16, #tpu.memory_space<vmem>>, vector<1x64x32xbf16>
    %369 = vector.shape_cast %368 : vector<1x64x32xbf16> to vector<64x32xbf16>
    %cst_150 = arith.constant dense<0.000000e+00> : vector<16x32xf32>
    %370 = tpu.matmul %367, %369, %cst_150 {dimension_numbers = #tpu.dot_dimension_numbers<[1], [0], [0], [1], [0, 0, 1, 1], [], []>} : vector<16x64xbf16>, vector<64x32xbf16>, vector<16x32xf32> -> vector<16x32xf32>
    %c1_151 = arith.constant 1 : index
    %c0_152 = arith.constant 0 : index
    %c0_153 = arith.constant 0 : index
    %371 = vector.load %arg12[%c1_151, %c0_152, %c0_153] : memref<2x1x32xf32, #tpu.memory_space<vmem>>, vector<1x1x32xf32>
    %372 = vector.shape_cast %371 : vector<1x1x32xf32> to vector<1x32xf32>
    %373 = vector.broadcast %372 : vector<1x32xf32> to vector<16x32xf32>
    %374 = arith.addf %370, %373 : vector<16x32xf32>
    %375 = arith.addf %345, %374 : vector<16x32xf32>
    %c1_154 = arith.constant 1 : index
    %c0_155 = arith.constant 0 : index
    %c0_156 = arith.constant 0 : index
    %376 = vector.load %arg13[%c1_154, %c0_155, %c0_156] : memref<2x1x32xf32, #tpu.memory_space<vmem>>, vector<1x1x32xf32>
    %377 = vector.shape_cast %376 : vector<1x1x32xf32> to vector<1x32xf32>
    %c1_157 = arith.constant 1 : index
    %c0_158 = arith.constant 0 : index
    %c0_159 = arith.constant 0 : index
    %378 = vector.load %arg14[%c1_157, %c0_158, %c0_159] : memref<2x1x32xf32, #tpu.memory_space<vmem>>, vector<1x1x32xf32>
    %379 = vector.shape_cast %378 : vector<1x1x32xf32> to vector<1x32xf32>
    %cst_160 = arith.constant dense<0.000000e+00> : vector<16xf32>
    %380 = vector.multi_reduction <add>, %375, %cst_160 [1] : vector<16x32xf32> to vector<16xf32>
    %381 = vector.shape_cast %380 : vector<16xf32> to vector<16x1xf32>
    %cst_161 = arith.constant 3.200000e+01 : f32
    %382 = vector.broadcast %cst_161 : f32 to vector<16x1xf32>
    %383 = arith.divf %381, %382 : vector<16x1xf32>
    %384 = vector.broadcast %383 : vector<16x1xf32> to vector<16x32xf32>
    %385 = arith.subf %375, %384 : vector<16x32xf32>
    %386 = arith.mulf %385, %385 : vector<16x32xf32>
    %cst_162 = arith.constant dense<0.000000e+00> : vector<16xf32>
    %387 = vector.multi_reduction <add>, %386, %cst_162 [1] : vector<16x32xf32> to vector<16xf32>
    %388 = vector.shape_cast %387 : vector<16xf32> to vector<16x1xf32>
    %cst_163 = arith.constant 3.200000e+01 : f32
    %389 = vector.broadcast %cst_163 : f32 to vector<16x1xf32>
    %390 = arith.divf %388, %389 : vector<16x1xf32>
    %391 = vector.broadcast %383 : vector<16x1xf32> to vector<16x32xf32>
    %392 = arith.subf %375, %391 : vector<16x32xf32>
    %cst_164 = arith.constant 9.99999996E-13 : f32
    %393 = vector.broadcast %cst_164 : f32 to vector<16x1xf32>
    %394 = arith.addf %390, %393 : vector<16x1xf32>
    %395 = math.rsqrt %394 : vector<16x1xf32>
    %396 = vector.broadcast %395 : vector<16x1xf32> to vector<16x32xf32>
    %397 = arith.mulf %392, %396 : vector<16x32xf32>
    %398 = vector.broadcast %377 : vector<1x32xf32> to vector<16x32xf32>
    %399 = arith.mulf %397, %398 : vector<16x32xf32>
    %400 = vector.broadcast %379 : vector<1x32xf32> to vector<16x32xf32>
    %401 = arith.addf %399, %400 : vector<16x32xf32>
    %402 = vector.shape_cast %401 : vector<16x32xf32> to vector<2x8x32xf32>
    %c0_165 = arith.constant 0 : index
    %c0_166 = arith.constant 0 : index
    %c0_167 = arith.constant 0 : index
    %403 = vector.load %arg17[%c0_165, %c0_166, %c0_167] : memref<2x8x32xf32, #tpu.memory_space<vmem>>, vector<2x8x32xf32>
    tpu.vector_store %arg17[%c0_165, %c0_166, %c0_167], %402 {strides = array<i32>} : memref<2x8x32xf32, #tpu.memory_space<vmem>>, vector<2x8x32xf32>,
    %404 = vector.extract_strided_slice %402 {offsets = [0, 0, 0], sizes = [2, 1, 32], strides = [1, 1, 1]} : vector<2x8x32xf32> to vector<2x1x32xf32>
    %405 = vector.shape_cast %404 : vector<2x1x32xf32> to vector<2x32xf32>
    %406 = arith.truncf %405 : vector<2x32xf32> to vector<2x32xbf16>
    %c0_168 = arith.constant 0 : index
    %c0_169 = arith.constant 0 : index
    %407 = vector.load %arg15[%c0_168, %c0_169] : memref<32x32xbf16, #tpu.memory_space<vmem>>, vector<32x32xbf16>
    %cst_170 = arith.constant dense<0.000000e+00> : vector<2x32xf32>
    %408 = tpu.matmul %406, %407, %cst_170 {dimension_numbers = #tpu.dot_dimension_numbers<[1], [0], [0], [1], [0, 0, 1, 1], [], []>} : vector<2x32xbf16>, vector<32x32xbf16>, vector<2x32xf32> -> vector<2x32xf32>
    %c0_171 = arith.constant 0 : index
    %c0_172 = arith.constant 0 : index
    %409 = vector.load %arg16[%c0_171, %c0_172] : memref<1x32xf32, #tpu.memory_space<vmem>>, vector<1x32xf32>
    %410 = vector.broadcast %409 : vector<1x32xf32> to vector<2x32xf32>
    %411 = arith.addf %408, %410 : vector<2x32xf32>
    %412 = math.tanh %411 : vector<2x32xf32>
    %c0_173 = arith.constant 0 : index
    %c0_174 = arith.constant 0 : index
    %413 = vector.load %arg18[%c0_173, %c0_174] : memref<2x32xf32, #tpu.memory_space<vmem>>, vector<2x32xf32>
    tpu.vector_store %arg18[%c0_173, %c0_174], %412 {strides = array<i32>} : memref<2x32xf32, #tpu.memory_space<vmem>>, vector<2x32xf32>,
    return
  }
}

</mosaic_0001>

<bundles_post_ra>
// kernel: tpu_custom_call.1
= control target key start
LH: loop header
LB: loop body
LE: loop exit
PB: predicated region body
PF: predicated region fallthrough
CT: control target
= control target key end

     0   :  { %s6068_s0 = inlined_call_operand.hbm [shape: f32[2,8,32], index: 0, kind: input, shape index: {}]   ;;  %s6069_s1 = inlined_call_operand.vmem [shape: f32[1,32], index: 1, kind: input, shape index: {}]   ;;  %s6070_s2 = inlined_call_operand.hbm [shape: f32[1,32], index: 2, kind: input, shape index: {}]   ;;  %s6071_s3 = inlined_call_operand.vmem [shape: bf16[2,32,96], index: 3, kind: input, shape index: {}]   ;;  %s6072_s4 = inlined_call_operand.hbm [shape: f32[2,1,96], index: 4, kind: input, shape index: {}]   ;;  %s6073_s5 = inlined_call_operand.vmem [shape: f32[2,32,32], index: 5, kind: input, shape index: {}]   ;;  %s6074_s6 = inlined_call_operand.hbm [shape: f32[2,1,32], index: 6, kind: input, shape index: {}]   ;;  %s6075_s7 = inlined_call_operand.hbm [shape: f32[2,1,32], index: 7, kind: input, shape index: {}]   ;;  %s6076_s8 = inlined_call_operand.hbm [shape: f32[2,1,32], index: 8, kind: input, shape index: {}]   ;;  %s6077_s9 = inlined_call_operand.hbm [shape: bf16[2,32,64], index: 9, kind: input, shape index: {}]   ;;  %s6078_s10 = inlined_call_operand.hbm [shape: f32[2,1,64], index: 10, kind: input, shape index: {}]   ;;  %s6079_s11 = inlined_call_operand.vmem [shape: bf16[2,64,32], index: 11, kind: input, shape index: {}]   ;;  %s6080_s12 = inlined_call_operand.hbm [shape: f32[2,1,32], index: 12, kind: input, shape index: {}]   ;;  %s6081_s13 = inlined_call_operand.hbm [shape: f32[2,1,32], index: 13, kind: input, shape index: {}]   ;;  %s6082_s14 = inlined_call_operand.vmem [shape: f32[2,1,32], index: 14, kind: input, shape index: {}]   ;;  %s6083_s15 = inlined_call_operand.vmem [shape: bf16[32,32], index: 15, kind: input, shape index: {}]   ;;  %s6084_s16 = inlined_call_operand.vmem [shape: f32[1,32], index: 16, kind: input, shape index: {}]   ;;  %s6085_s17 = inlined_call_operand.hbm [shape: f32[2,8,32], index: 17, kind: output, shape index: {0}]   ;;  %s6086_s18 = inlined_call_operand.hbm [shape: f32[2,32], index: 18, kind: output, shape index: {1}]  }
   0x1   :  { %6091 = sst [smem:[#allocation30_spill]] %s6068_s0 }
   0x2   :  { %6092 = sst [smem:[#allocation31_spill]] %s6069_s1 }
   0x3   :  { %6093 = sst [smem:[#allocation32_spill]] %s6070_s2 }
   0x4   :  { %24 = vsyncpa [#allocation3], 0 }
   0x5   :  { %25 = vsyncpa [#allocation6], 0 }
   0x6   :  { %26 = vsyncpa [#allocation9], 0 }
   0x7   :  { %27 = vsyncpa [#allocation12], 0 }
   0x8   :  { %28 = vsyncpa [#allocation15], 0 }
   0x9   :  { %29 = vsyncpa [#allocation18], 0 }
   0xa   :  { %30 = vsyncpa [#allocation4], 0 }
   0xb   :  { %31 = vsyncpa [#allocation21], 0  ;;  %s5304_s27 = smov [#allocation5]   ;;  %s6094_s0 = sld [smem:[#allocation32_spill]] }
   0xc   :  { %s52_s28 = sshll.u32 %s5304_s27, 4  ;;  %s53_s28 = int_to_ptr.vmem [resolvable:$true] %s52_s28 }
  0x11   :  { %s5024_s19 = scalar_lea.hbm %s6094_s0, 16 }
  0x12   :  { %p5025_p0 = scmp.ne.s32.totalorder %s6094_s0, %s5024_s19  ;;  %p5028_p1 = scmp.lt.u32.totalorder %s5024_s19, %s6094_s0 }
  0x14   :  { %p5030_p2 = pnand %p5028_p1, %p5025_p0 }
  0x16   :  { %5033 = shalt.err (!%p5030_p2)
}
  0x17   :  { %s5034_s2 = scalar_lea.vmem %s53_s28, 16  ;;  %s5038_s23 = scalar_lea.vmem %s53_s28, 32 }
  0x18   :  { %p5035_p3 = scmp.ne.s32.totalorder %s53_s28, %s5034_s2  ;;  %p5039_p4 = scmp.lt.s32.totalorder %s53_s28, %s53_s28 }
  0x19   :  { %p5040_p5 = scmp.lt.s32.totalorder %s5038_s23, %s5034_s2 }
  0x1b   :  { %p5041_p6 = por %p5040_p5, %p5039_p4 }
  0x1d   :  { %p5042_p7 = pnand %p5041_p6, %p5035_p3 }
  0x1f   :  { %5045 = shalt.err (!%p5042_p7)
}
  0x20   :  { %55 = dma.hbm_to_vmem [thread:$0]  %s6094_s0, 16, %s53_s28, [#allocation6]  }
  0x21   :  { %s5305_s26 = smov [#allocation8]   ;;  %s5306_s29 = smov [#allocation11]  }
  0x22   :  { %s77_s27 = sshll.u32 %s5305_s26, 4  ;;  %s101_s30 = sshll.u32 %s5306_s29, 4  ;;  %s78_s27 = int_to_ptr.vmem [resolvable:$true] %s77_s27  ;;  %s102_s30 = int_to_ptr.vmem [resolvable:$true] %s101_s30 }
  0x23   :  { %s5046_s20 = scalar_lea.hbm %s6074_s6, 32 }
  0x24   :  { %p5047_p8 = scmp.ne.s32.totalorder %s6074_s6, %s5046_s20  ;;  %p5050_p9 = scmp.lt.u32.totalorder %s5046_s20, %s6074_s6 }
  0x26   :  { %p5052_p10 = pnand %p5050_p9, %p5047_p8 }
  0x28   :  { %5055 = shalt.err (!%p5052_p10)
}
  0x29   :  { %s5056_s28 = scalar_lea.vmem %s78_s27, 32  ;;  %p5061_p12 = scmp.lt.s32.totalorder %s78_s27, %s78_s27 }
  0x2a   :  { %p5057_p11 = scmp.ne.s32.totalorder %s78_s27, %s5056_s28  ;;  %p5062_p13 = scmp.lt.s32.totalorder %s5056_s28, %s5056_s28 }
  0x2c   :  { %p5063_p0 = por %p5062_p13, %p5061_p12 }
  0x2e   :  { %p5064_p1 = pnand %p5063_p0, %p5057_p11 }
  0x30   :  { %5067 = shalt.err (!%p5064_p1)
}
  0x31   :  { %s6089_s0 = smov 16   ;;  %s5308_s24 = smov 1  }
  0x32   :  { %83 = dma.hbm_to_vmem [thread:$0]  %s6074_s6, 32, %s78_s27, [#allocation9], %s6089_s0, %s6089_s0, %s5308_s24  }
  0x33   :  { %s5068_s1 = scalar_lea.hbm %s6076_s8, 32 }
  0x34   :  { %p5069_p2 = scmp.ne.s32.totalorder %s6076_s8, %s5068_s1  ;;  %p5072_p3 = scmp.lt.u32.totalorder %s5068_s1, %s6076_s8 }
  0x36   :  { %p5074_p4 = pnand %p5072_p3, %p5069_p2 }
  0x38   :  { %5077 = shalt.err (!%p5074_p4)
}
  0x39   :  { %s5078_s23 = scalar_lea.vmem %s102_s30, 32  ;;  %p5083_p6 = scmp.lt.s32.totalorder %s102_s30, %s102_s30 }
  0x3a   :  { %p5079_p5 = scmp.ne.s32.totalorder %s102_s30, %s5078_s23  ;;  %p5084_p7 = scmp.lt.s32.totalorder %s5078_s23, %s5078_s23 }
  0x3c   :  { %p5085_p8 = por %p5084_p7, %p5083_p6 }
  0x3e   :  { %p5086_p9 = pnand %p5085_p8, %p5079_p5 }
  0x40   :  { %5089 = shalt.err (!%p5086_p9)
}
  0x41   :  { %107 = dma.hbm_to_vmem [thread:$0]  %s6076_s8, 32, %s102_s30, [#allocation12], %s6089_s0, %s6089_s0, %s5308_s24  }
  0x42   :  { %s5309_s28 = smov [#allocation14]   ;;  %s5310_s26 = smov [#allocation2]  }
  0x43   :  { %s125_s25 = sshll.u32 %s5309_s28, 4  ;;  %s37_s29 = sshll.u32 %s5310_s26, 4  ;;  %s126_s25 = int_to_ptr.vmem [resolvable:$true] %s125_s25  ;;  %s38_s29 = int_to_ptr.vmem [resolvable:$true] %s37_s29 }
  0x44   :  { %s5090_s20 = scalar_lea.hbm %s6078_s10, 32 }
  0x45   :  { %p5091_p10 = scmp.ne.s32.totalorder %s6078_s10, %s5090_s20  ;;  %p5094_p11 = scmp.lt.u32.totalorder %s5090_s20, %s6078_s10 }
  0x47   :  { %p5096_p12 = pnand %p5094_p11, %p5091_p10 }
  0x49   :  { %5099 = shalt.err (!%p5096_p12)
}
  0x4a   :  { %s5100_s8 = scalar_lea.vmem %s126_s25, 32  ;;  %p5105_p0 = scmp.lt.s32.totalorder %s126_s25, %s126_s25 }
  0x4b   :  { %p5101_p13 = scmp.ne.s32.totalorder %s126_s25, %s5100_s8  ;;  %p5106_p1 = scmp.lt.s32.totalorder %s5100_s8, %s5100_s8 }
  0x4d   :  { %p5107_p2 = por %p5106_p1, %p5105_p0 }
  0x4f   :  { %p5108_p3 = pnand %p5107_p2, %p5101_p13 }
  0x51   :  { %5111 = shalt.err (!%p5108_p3)
}
  0x52   :  { %131 = dma.hbm_to_vmem [thread:$0]  %s6078_s10, 32, %s126_s25, [#allocation15], %s6089_s0, %s6089_s0, %s5308_s24  }
  0x53   :  { %s6095_s26 = sld [smem:[#allocation30_spill]] }
  0x59   :  { %s5112_s19 = scalar_lea.hbm %s6095_s26, 256 }
  0x5a   :  { %p5113_p4 = scmp.ne.s32.totalorder %s6095_s26, %s5112_s19  ;;  %p5116_p5 = scmp.lt.u32.totalorder %s5112_s19, %s6095_s26 }
  0x5c   :  { %p5118_p6 = pnand %p5116_p5, %p5113_p4 }
  0x5e   :  { %5121 = shalt.err (!%p5118_p6)
}
  0x5f   :  { %s5122_s2 = scalar_lea.vmem %s38_s29, 256  ;;  %p5127_p8 = scmp.lt.s32.totalorder %s38_s29, %s38_s29 }
  0x60   :  { %p5123_p7 = scmp.ne.s32.totalorder %s38_s29, %s5122_s2  ;;  %p5128_p9 = scmp.lt.s32.totalorder %s5122_s2, %s5122_s2 }
  0x62   :  { %p5129_p10 = por %p5128_p9, %p5127_p8 }
  0x64   :  { %p5130_p11 = pnand %p5129_p10, %p5123_p7 }
  0x66   :  { %5133 = shalt.err (!%p5130_p11)
}
  0x67   :  { %s5311_s10 = smov 128   ;;  %s5312_s25 = smov 8  }
  0x68   :  { %43 = dma.hbm_to_vmem [thread:$0]  %s6095_s26, 256, %s38_s29, [#allocation3], %s5311_s10, %s5311_s10, %s5312_s25  }
  0x69   :  { %s5313_s30 = smov [#allocation7]   ;;  %s5314_s27 = smov [#allocation10]  }
  0x6a   :  { %s63_s6 = sshll.u32 %s5313_s30, 4  ;;  %s89_s28 = sshll.u32 %s5314_s27, 4  ;;  %s64_s6 = int_to_ptr.vmem [resolvable:$true] %s63_s6  ;;  %s90_s28 = int_to_ptr.vmem [resolvable:$true] %s89_s28 }
  0x6b   :  { %s5134_s20 = scalar_lea.hbm %s6072_s4, 32 }
  0x6c   :  { %p5135_p12 = scmp.ne.s32.totalorder %s6072_s4, %s5134_s20  ;;  %p5138_p13 = scmp.lt.u32.totalorder %s5134_s20, %s6072_s4 }
  0x6e   :  { %p5140_p0 = pnand %p5138_p13, %p5135_p12 }
  0x70   :  { %5143 = shalt.err (!%p5140_p0)
}
  0x71   :  { %s5144_s29 = scalar_lea.vmem %s64_s6, 32  ;;  %p5149_p2 = scmp.lt.s32.totalorder %s64_s6, %s64_s6 }
  0x72   :  { %p5145_p1 = scmp.ne.s32.totalorder %s64_s6, %s5144_s29  ;;  %p5150_p3 = scmp.lt.s32.totalorder %s5144_s29, %s5144_s29 }
  0x74   :  { %p5151_p4 = por %p5150_p3, %p5149_p2 }
  0x76   :  { %p5152_p5 = pnand %p5151_p4, %p5145_p1 }
  0x78   :  { %5155 = shalt.err (!%p5152_p5)
}
  0x79   :  { %s6096_s26 = smov 16   ;;  %s5156_s27 = scalar_lea.hbm %s6075_s7, 32 }
  0x7a   :  { %69 = dma.hbm_to_vmem [thread:$0]  %s6072_s4, 32, %s64_s6, [#allocation6], %s6096_s26, %s6096_s26, %s5308_s24  }
  0x7b   :  { %p5157_p6 = scmp.ne.s32.totalorder %s6075_s7, %s5156_s27  ;;  %p5160_p7 = scmp.lt.u32.totalorder %s5156_s27, %s6075_s7 }
  0x7d   :  { %p5162_p8 = pnand %p5160_p7, %p5157_p6 }
  0x7f   :  { %5165 = shalt.err (!%p5162_p8)
}
  0x80   :  { %s5166_s22 = scalar_lea.vmem %s90_s28, 32  ;;  %p5171_p10 = scmp.lt.s32.totalorder %s90_s28, %s90_s28 }
  0x81   :  { %p5167_p9 = scmp.ne.s32.totalorder %s90_s28, %s5166_s22  ;;  %p5172_p11 = scmp.lt.s32.totalorder %s5166_s22, %s5166_s22 }
  0x83   :  { %p5173_p12 = por %p5172_p11, %p5171_p10 }
  0x85   :  { %p5174_p13 = pnand %p5173_p12, %p5167_p9 }
  0x87   :  { %5177 = shalt.err (!%p5174_p13)
}
  0x88   :  { %95 = dma.hbm_to_vmem [thread:$0]  %s6075_s7, 32, %s90_s28, [#allocation9], %s6096_s26, %s6096_s26, %s5308_s24  }
  0x89   :  { %s5315_s2 = smov [#allocation13]   ;;  %s5178_s30 = scalar_lea.hbm %s6077_s9, 512 }
  0x8a   :  { %s113_s29 = sshll.u32 %s5315_s2, 4  ;;  %p5179_p0 = scmp.ne.s32.totalorder %s6077_s9, %s5178_s30  ;;  %s114_s29 = int_to_ptr.vmem [resolvable:$true] %s113_s29 }
  0x8b   :  { %p5182_p1 = scmp.lt.u32.totalorder %s5178_s30, %s6077_s9 }
  0x8d   :  { %p5184_p2 = pnand %p5182_p1, %p5179_p0 }
  0x8f   :  { %5187 = shalt.err (!%p5184_p2)
}
  0x90   :  { %s5188_s20 = scalar_lea.vmem %s114_s29, 512  ;;  %p5193_p4 = scmp.lt.s32.totalorder %s114_s29, %s114_s29 }
  0x91   :  { %p5189_p3 = scmp.ne.s32.totalorder %s114_s29, %s5188_s20  ;;  %p5194_p5 = scmp.lt.s32.totalorder %s5188_s20, %s5188_s20 }
  0x93   :  { %p5195_p6 = por %p5194_p5, %p5193_p4 }
  0x95   :  { %p5196_p7 = pnand %p5195_p6, %p5189_p3 }
  0x97   :  { %5199 = shalt.err (!%p5196_p7)
}
  0x98   :  { %s5316_s7 = smov 64   ;;  %s5317_s28 = smov 4  }
  0x99   :  { %119 = dma.hbm_to_vmem [thread:$0]  %s6077_s9, 512, %s114_s29, [#allocation12], %s5316_s7, %s5316_s7, %s5317_s28  }
  0x9a   :  { %s5318_s4 = smov [#allocation16]   ;;  %s5319_s2 = smov [#allocation17]  }
  0x9b   :  { %s139_s6 = sshll.u32 %s5318_s4, 4  ;;  %s151_s23 = sshll.u32 %s5319_s2, 4  ;;  %s140_s6 = int_to_ptr.vmem [resolvable:$true] %s139_s6  ;;  %s5545_s23 = int_to_ptr.vmem [resolvable:$true] %s151_s23 }
  0x9c   :  { %s5200_s0 = scalar_lea.hbm %s6080_s12, 32 }
  0x9d   :  { %p5201_p8 = scmp.ne.s32.totalorder %s6080_s12, %s5200_s0  ;;  %p5204_p9 = scmp.lt.u32.totalorder %s5200_s0, %s6080_s12 }
  0x9f   :  { %p5206_p10 = pnand %p5204_p9, %p5201_p8 }
  0xa1   :  { %5209 = shalt.err (!%p5206_p10)
}
  0xa2   :  { %s5210_s9 = scalar_lea.vmem %s140_s6, 32  ;;  %p5215_p12 = scmp.lt.s32.totalorder %s140_s6, %s140_s6 }
  0xa3   :  { %p5211_p11 = scmp.ne.s32.totalorder %s140_s6, %s5210_s9  ;;  %p5216_p13 = scmp.lt.s32.totalorder %s5210_s9, %s5210_s9 }
  0xa5   :  { %p5217_p0 = por %p5216_p13, %p5215_p12 }
  0xa7   :  { %p5218_p1 = pnand %p5217_p0, %p5211_p11 }
  0xa9   :  { %5221 = shalt.err (!%p5218_p1)
}
  0xaa   :  { %145 = dma.hbm_to_vmem [thread:$0]  %s6080_s12, 32, %s140_s6, [#allocation15], %s6096_s26, %s6096_s26, %s5308_s24  }
  0xab   :  { %s5222_s4 = scalar_lea.hbm %s6081_s13, 32 }
  0xac   :  { %p5223_p2 = scmp.ne.s32.totalorder %s6081_s13, %s5222_s4  ;;  %p5226_p3 = scmp.lt.u32.totalorder %s5222_s4, %s6081_s13 }
  0xae   :  { %p5228_p4 = pnand %p5226_p3, %p5223_p2 }
  0xb0   :  { %5231 = shalt.err (!%p5228_p4)
}
  0xb1   :  { %s5232_s27 = scalar_lea.vmem %s5545_s23, 32  ;;  %p5237_p6 = scmp.lt.s32.totalorder %s5545_s23, %s5545_s23 }
  0xb2   :  { %p5233_p5 = scmp.ne.s32.totalorder %s5545_s23, %s5232_s27  ;;  %p5238_p7 = scmp.lt.s32.totalorder %s5232_s27, %s5232_s27 }
  0xb4   :  { %p5239_p8 = por %p5238_p7, %p5237_p6 }
  0xb6   :  { %p5240_p9 = pnand %p5239_p8, %p5233_p5 }
  0xb8   :  { %5243 = shalt.err (!%p5240_p9)
}
  0xb9   :  { %157 = dma.hbm_to_vmem [thread:$0]  %s6081_s13, 32, %s5545_s23, [#allocation18], %s6096_s26, %s6096_s26, %s5308_s24  }
  0xba   :  { %5288 = dma.done.wait [#allocation3], 256  }
  0xbb   :  { %5289 = vsyncadd [#allocation3], 4294967040 }
  0xbc   :  { %5290 = dma.done.wait [#allocation6], 48  }
  0xbd   :  { %5291 = vsyncadd [#allocation6], 4294967248 }
  0xbe   :  { %5292 = dma.done.wait [#allocation9], 64  }
  0xbf   :  { %5293 = vsyncadd [#allocation9], 4294967232 }
  0xc0   :  { %5294 = dma.done.wait [#allocation12], 544  }
  0xc1   :  { %5295 = vsyncadd [#allocation12], 4294966752 }
  0xc2   :  { %5296 = dma.done.wait [#allocation15], 64  }
  0xc3   :  { %5297 = vsyncadd [#allocation15], 4294967232 }
  0xc4   :  { %5298 = dma.done.wait [#allocation18], 32  }
  0xc5   :  { %5299 = vsyncadd [#allocation18], 4294967264  ;;  %vm199_vm0 = vcmask 261120   ;;  %v195_v0 = vld [vmem:[#allocation2] sm:$0xff]  ;;  %v196_v1 = vld [vmem:[#allocation2 + $0x8] sm:$0xff]  ;;  %v5320_v15 = vmov 0.0  }
  0xc6   :  { %v200_v2 = vsel %vm199_vm0, %v195_v0, 0.0  ;;  %v203_v3 = vsel %vm199_vm0, %v196_v1, 0.0  ;;  %v4912_v14 = vld [vmem:[%s6071_s3] sm:$0xff]   ;;  %4606 = vmatprep.subr.bf16.mxu0 %v5320_v15  ;;  %4614 = vmatprep.subr.mxu1 %v5320_v15  ;;  %v4913_v16 = vld [vmem:[%s6071_s3 + $0x8] sm:$0xff]   ;;  %vm5321_vm1 = vmmov 0   ;;  %s6097_s20 = sld [smem:[#allocation31_spill]] }
  0xc7   :  { %201 = vadd.xlane.f32.xlu0 %v200_v2  ;;  %4607 = vmatpush3.bf16.msra.mxu0 %v4912_v14  ;;  %v4369_v29 = vld [vmem:[#allocation5] ss:$0 sm:$0xff]  ;;  %v4370_v34 = vld [vmem:[#allocation7] ss:$0 sm:$0xff]  ;;  %s5322_s9 = smov 96   ;;  %vm318_vm2 = vcmask 64512  }
  0xc8   :  { %4610 = vmatprep.mubr.msk.bf16.mxu0 %vm5321_vm1, %v5320_v15  ;;  %4608 = vmatprep.subr.bf16.mxu0 %v5320_v15  ;;  %s5323_s29 = smov 88   ;;  %s5324_s28 = smov 120   ;;  %vm2151_vm3 = vcmask 523264   ;;  %vm4271_vm4 = vcmask 1041409  }
  0xc9   :  { %4616 = vmatprep.mubr.msk.f32.mxu1 %vm5321_vm1, %v5320_v15  ;;  %s5325_s21 = smov 80   ;;  %s5326_s22 = smov 56  }
  0xca   :  { %s5327_s4 = smov 112   ;;  %s5328_s2 = smov 48  }
  0xcb   :  { %204 = vadd.xlane.f32.xlu0 %v203_v3  ;;  %4609 = vmatpush3.bf16.msra.mxu0 %v4913_v16  ;;  %s5329_s8 = smov 72   ;;  %s5330_s30 = smov 104  }
  0xcc   :  { %4629 = vmatprep.subr.mxu0 %v5320_v15  ;;  %v4368_v25 = vld [vmem:[%s6097_s20] ss:$0 sm:$0xff]  ;;  %s5331_s26 = smov 40  }
 0x154   :  { %v202_v4 = vpop.xlane.xlu0 %201 }
 0x155   :  { %v207_v5 = vmul.f32 0.03125, %v202_v4 }
 0x157   :  { %v209_v6 = vsub.f32 %v195_v0, %v207_v5 }
 0x158   :  { %v205_v7 = vpop.xlane.xlu0 %204 }
 0x159   :  { %v208_v8 = vmul.f32 0.03125, %v205_v7  ;;  %v211_v9 = vmul.f32 %v209_v6, %v209_v6 }
 0x15b   :  { %v210_v10 = vsub.f32 %v196_v1, %v208_v8  ;;  %v213_v11 = vsel %vm199_vm0, %v211_v9, 0.0 }
 0x15c   :  { %214 = vadd.xlane.f32.xlu1 %v213_v11 }
 0x15d   :  { %v212_v12 = vmul.f32 %v210_v10, %v210_v10 }
 0x15f   :  { %v216_v13 = vsel %vm199_vm0, %v212_v12, 0.0 }
 0x160   :  { %217 = vadd.xlane.f32.xlu1 %v216_v13 }
 0x1e9   :  { %v215_v17 = vpop.xlane.xlu1 %214 }
 0x1ea   :  { %v219_v18 = vmul.f32 0.03125, %v215_v17 }
 0x1ec   :  { %v221_v19 = vadd.f32 1e-12, %v219_v18 }
 0x1ed   :  { %v218_v20 = vpop.xlane.xlu1 %217 }
 0x1ee   :  { %4930 = vrsqrt.f32 %v221_v19  ;;  %v220_v21 = vmul.f32 0.03125, %v218_v20 }
 0x1f0   :  { %v222_v22 = vadd.f32 1e-12, %v220_v21 }
 0x1f2   :  { %4932 = vrsqrt.f32 %v222_v22 }
 0x1f8   :  { %v4931_v23 = vpop.eup %4930 }
 0x1f9   :  { %v225_v24 = vmul.f32 %v4931_v23, %v209_v6 }
 0x1fb   :  { %v233_v28 = vmul.f32 %v4368_v25, %v225_v24 }
 0x1fc   :  { %v4933_v26 = vpop.eup %4932 }
 0x1fd   :  { %v226_v27 = vmul.f32 %v4933_v26, %v210_v10  ;;  %v5603_v31 = vadd.f32 %v4369_v29, %v233_v28 }
 0x1ff   :  { %v234_v30 = vmul.f32 %v4368_v25, %v226_v27 }
 0x201   :  { %v5605_v32 = vadd.f32 %v4369_v29, %v234_v30 }
 0x203   :  { %v243_v33 = vpack.c.bf16 %v5605_v32, %v5603_v31 }
 0x205   :  { %4611 = vmatmul.mubr.msk.bf16.vlgmr.msra.gmra.mrb[0].mxu0 %vm199_vm0, %v243_v33 }
 0x206   :  { %4631 = vmatprep.mubr.msk.f32.mxu0 %vm5321_vm1, %v5320_v15 }
 0x2d8   :  { %v304_v35 = vpop.f32.mrb[0].mxu0 }
 0x2d9   :  { %v5612_v36 = vadd.f32 %v4370_v34, %v304_v35  ;;  %v4612_v37 = vpop.f32.mrb[1].mxu0 }
 0x2da   :  { %v307_v38 = vpop.f32.mrb[2].mxu0 }
 0x2db   :  { %v5614_v39 = vadd.f32 %v4370_v34, %v307_v38  ;;  %316 = vrot.lane.b32.xlu0 %v5612_v36, %s5322_s9  ;;  %v4613_v40 = vpop.f32.mrb[3].mxu0 }
 0x2dd   :  { %394 = vrot.lane.b32.xlu1 %v5614_v39, %s5322_s9 }
 0x34d   :  { %v317_v41 = vpop.permute.xlu0 %316 }
 0x34e   :  { %4615 = vmatpush3.xpose.msk.msra.mxu1 %vm318_vm2, %v317_v41 }
 0x34f   :  { %4619 = vmatprep.subr.mxu1 %v5320_v15  ;;  %v395_v42 = vpop.permute.xlu1 %394 }
 0x351   :  { %4617 = vmatmul.mubr.msk.f32.vlgmr.msra.gmra.mrb[0].mxu1 %vm318_vm2, %v5612_v36 }
 0x352   :  { %4620 = vmatpush3.xpose.msk.msra.mxu1 %vm318_vm2, %v395_v42  ;;  %4621 = vmatprep.mubr.msk.f32.mxu1 %vm5321_vm1, %v5320_v15 }
 0x353   :  { %4624 = vmatprep.subr.mxu1 %v5320_v15 }
 0x355   :  { %4622 = vmatmul.mubr.msk.f32.vlgmr.msra.gmra.mrb[2].mxu1 %vm318_vm2, %v5614_v39 }
 0x356   :  { %4626 = vmatprep.mubr.msk.f32.mxu1 %vm5321_vm1, %v5320_v15 }
 0x424   :  { %v389_v43 = vpop.f32.mrb[0].mxu1 }
 0x425   :  { %v4618_v44 = vpop.f32.mrb[1].mxu1  ;;  %v470_v49 = vmul.f32 0.35355338, %v389_v43 }
 0x427   :  { %v472_v50 = vsel %vm318_vm2, %v470_v49, -inf }
 0x428   :  { %v466_v45 = vpop.f32.mrb[2].mxu1 }
 0x429   :  { %v471_v46 = vmul.f32 0.35355338, %v466_v45  ;;  %v4623_v47 = vpop.f32.mrb[3].mxu1 }
 0x42b   :  { %v475_v48 = vsel %vm318_vm2, %v471_v46, -inf }
 0x42c   :  { %476 = vmax.xlane.f32.xlu1 %v475_v48 }
 0x43d   :  { %726 = vrot.lane.b32.xlu1 %v5614_v39, %s5323_s29 }
 0x441   :  { %724 = vrot.lane.b32.xlu1 %v5614_v39, %s5324_s28 }
 0x465   :  { %473 = vmax.xlane.f32.xlu1 %v472_v50 }
 0x476   :  { %648 = vrot.lane.b32.xlu1 %v5612_v36, %s5323_s29 }
 0x47a   :  { %646 = vrot.lane.b32.xlu1 %v5612_v36, %s5324_s28 }
 0x47e   :  { %1142 = vrot.lane.b32.xlu1 %v5612_v36, %s5325_s21 }
 0x4b9   :  { %v477_v51 = vpop.xlane.xlu1 %476 }
 0x4ba   :  { %v479_v52 = vsub.f32 %v471_v46, %v477_v51 }
 0x4bc   :  { %v482_v53 = vmul.f32 1.442695, %v479_v52 }
 0x4bd   :  { %v727_v56 = vpop.permute.xlu1 %726 }
 0x4be   :  { %4934 = vpow2.f32 %v482_v53 }
 0x4c1   :  { %v725_v57 = vpop.permute.xlu1 %724 }
 0x4c8   :  { %v4935_v54 = vpop.eup %4934 }
 0x4c9   :  { %v487_v55 = vsel %vm318_vm2, %v4935_v54, 0.0 }
 0x4ca   :  { %488 = vadd.xlane.f32.xlu0 %v487_v55 }
 0x4e0   :  { %570 = vrot.lane.b32.xlu0 %v5614_v39, %s5316_s7 }
 0x4f2   :  { %v474_v58 = vpop.xlane.xlu1 %473 }
 0x4f3   :  { %v478_v59 = vsub.f32 %v470_v49, %v474_v58 }
 0x4f5   :  { %v480_v60 = vmul.f32 1.442695, %v478_v59  ;;  %v312_v59 = vld [vmem:[%s6073_s5 + $0x8] sm:$0xff] }
 0x4f6   :  { %v649_v6 = vpop.permute.xlu1 %648 }
 0x4f7   :  { %4936 = vpow2.f32 %v480_v60  ;;  %v311_v60 = vld [vmem:[%s6073_s5] sm:$0xff] }
 0x4fa   :  { %v647_v8 = vpop.permute.xlu1 %646 }
 0x4fe   :  { %v1143_v28 = vpop.permute.xlu1 %1142 }
 0x501   :  { %v4937_v61 = vpop.eup %4936 }
 0x502   :  { %v484_v62 = vsel %vm318_vm2, %v4937_v61, 0.0 }
 0x503   :  { %485 = vadd.xlane.f32.xlu0 %v484_v62 }
 0x519   :  { %494 = vrot.lane.b32.xlu0 %v5612_v36, %s5316_s7 }
 0x557   :  { %v489_v63 = vpop.xlane.xlu0 %488 }
 0x558   :  { %4938 = vrcp.f32 %v489_v63 }
 0x55b   :  { %v571_v0 = vpop.permute.xlu0 %570 }
 0x55c   :  { %4630 = vmatpush3.msra.mxu0 %v571_v0 }
 0x55d   :  { %4639 = vmatprep.subr.mxu0 %v5320_v15 }
 0x562   :  { %v4939_v1 = vpop.eup %4938 }
 0x563   :  { %v493_v2 = vmul.f32 %v4939_v1, %v4935_v54 }
 0x565   :  { %4632 = vmatmul.mubr.msk.f32.vlgmr.msra.gmra.mrb[4].mxu0 %vm318_vm2, %v493_v2 }
 0x566   :  { %4640 = vmatpush3.xpose.msk.msra.mxu0 %vm318_vm2, %v727_v56  ;;  %4641 = vmatprep.mubr.msk.f32.mxu0 %vm5321_vm1, %v5320_v15 }
 0x567   :  { %4649 = vmatprep.subr.mxu0 %v5320_v15 }
 0x569   :  { %4642 = vmatmul.mubr.msk.f32.vlgmr.msra.gmra.mrb[6].mxu0 %vm318_vm2, %v725_v57 }
 0x56a   :  { %4651 = vmatprep.mubr.msk.f32.mxu0 %vm5321_vm1, %v5320_v15 }
 0x590   :  { %v486_v3 = vpop.xlane.xlu0 %485 }
 0x591   :  { %4940 = vrcp.f32 %v486_v3 }
 0x594   :  { %v495_v4 = vpop.permute.xlu0 %494 }
 0x595   :  { %4625 = vmatpush3.msra.mxu1 %v495_v4 }
 0x596   :  { %4634 = vmatprep.subr.mxu1 %v5320_v15 }
 0x59b   :  { %v4941_v5 = vpop.eup %4940 }
 0x59c   :  { %v492_v7 = vmul.f32 %v4941_v5, %v4937_v61 }
 0x59e   :  { %4627 = vmatmul.mubr.msk.f32.vlgmr.msra.gmra.mrb[4].mxu1 %vm318_vm2, %v492_v7 }
 0x59f   :  { %4635 = vmatpush3.xpose.msk.msra.mxu1 %vm318_vm2, %v649_v6  ;;  %4636 = vmatprep.mubr.msk.f32.mxu1 %vm5321_vm1, %v5320_v15 }
 0x5a0   :  { %4644 = vmatprep.subr.mxu1 %v5320_v15 }
 0x5a2   :  { %4637 = vmatmul.mubr.msk.f32.vlgmr.msra.gmra.mrb[6].mxu1 %vm318_vm2, %v647_v8 }
 0x5a3   :  { %4646 = vmatprep.mubr.msk.f32.mxu1 %vm5321_vm1, %v5320_v15 }
 0x638   :  { %v5668_v9 = vpop.f32.mrb[4].mxu0 }
 0x639   :  { %v4633_v10 = vpop.f32.mrb[5].mxu0 }
 0x63c   :  { %v798_v11 = vpop.f32.mrb[6].mxu0 }
 0x63d   :  { %v803_v12 = vmul.f32 0.35355338, %v798_v11  ;;  %v4643_v13 = vpop.f32.mrb[7].mxu0 }
 0x63f   :  { %v807_v14 = vsel %vm318_vm2, %v803_v12, -inf }
 0x640   :  { %808 = vmax.xlane.f32.xlu0 %v807_v14 }
 0x656   :  { %902 = vrot.lane.b32.xlu0 %v5614_v39, %s5326_s22 }
 0x65a   :  { %1140 = vrot.lane.b32.xlu0 %v5612_v36, %s5327_s4 }
 0x65e   :  { %1218 = vrot.lane.b32.xlu0 %v5614_v39, %s5327_s4 }
 0x671   :  { %v5677_v16 = vpop.f32.mrb[4].mxu1 }
 0x672   :  { %v4628_v17 = vpop.f32.mrb[5].mxu1 }
 0x675   :  { %v720_v18 = vpop.f32.mrb[6].mxu1 }
 0x676   :  { %v4638_v19 = vpop.f32.mrb[7].mxu1  ;;  %v802_v26 = vmul.f32 0.35355338, %v720_v18 }
 0x678   :  { %v804_v27 = vsel %vm318_vm2, %v802_v26, -inf }
 0x6cd   :  { %v809_v20 = vpop.xlane.xlu0 %808 }
 0x6ce   :  { %v811_v21 = vsub.f32 %v803_v12, %v809_v20  ;;  %v313_v12 = vld [vmem:[%s6073_s5 + $0x10] sm:$0xff] }
 0x6d0   :  { %v814_v22 = vmul.f32 1.442695, %v811_v21 }
 0x6d1   :  { %v903_v23 = vpop.permute.xlu0 %902 }
 0x6d2   :  { %4942 = vpow2.f32 %v814_v22  ;;  %4650 = vmatpush3.msra.mxu0 %v903_v23 }
 0x6d3   :  { %4664 = vmatprep.subr.mxu0 %v5320_v15 }
 0x6d5   :  { %v1141_v34 = vpop.permute.xlu0 %1140 }
 0x6d9   :  { %v1219_v37 = vpop.permute.xlu0 %1218 }
 0x6dc   :  { %v4943_v24 = vpop.eup %4942 }
 0x6dd   :  { %v819_v25 = vsel %vm318_vm2, %v4943_v24, 0.0 }
 0x6de   :  { %820 = vadd.xlane.f32.xlu1 %v819_v25 }
 0x6ef   :  { %1220 = vrot.lane.b32.xlu1 %v5614_v39, %s5325_s21 }
 0x713   :  { %805 = vmax.xlane.f32.xlu1 %v804_v27 }
 0x76b   :  { %v821_v29 = vpop.xlane.xlu1 %820 }
 0x76c   :  { %4944 = vrcp.f32 %v821_v29 }
 0x76f   :  { %v1221_v35 = vpop.permute.xlu1 %1220 }
 0x776   :  { %v4945_v30 = vpop.eup %4944 }
 0x777   :  { %v825_v33 = vmul.f32 %v4945_v30, %v4943_v24 }
 0x779   :  { %4652 = vmatmul.mubr.msk.f32.vlgmr.msra.gmra.mrb[8].mxu0 %vm318_vm2, %v825_v33 }
 0x77a   :  { %4665 = vmatpush3.xpose.msk.msra.mxu0 %vm318_vm2, %v1143_v28  ;;  %4666 = vmatprep.mubr.msk.f32.mxu0 %vm5321_vm1, %v5320_v15 }
 0x77b   :  { %4669 = vmatprep.subr.mxu0 %v5320_v15 }
 0x77d   :  { %4667 = vmatmul.mubr.msk.f32.vlgmr.msra.gmra.mrb[10].mxu0 %vm318_vm2, %v1141_v34 }
 0x77e   :  { %4670 = vmatpush3.xpose.msk.msra.mxu0 %vm318_vm2, %v1221_v35  ;;  %4671 = vmatprep.mubr.msk.f32.mxu0 %vm5321_vm1, %v5320_v15 }
 0x77f   :  { %4679 = vmatprep.subr.mxu0 %v5320_v15 }
 0x781   :  { %4672 = vmatmul.mubr.msk.f32.vlgmr.msra.gmra.mrb[12].mxu0 %vm318_vm2, %v1219_v37 }
 0x782   :  { %4681 = vmatprep.mubr.msk.f32.mxu0 %vm5321_vm1, %v5320_v15 }
 0x7a0   :  { %v806_v38 = vpop.xlane.xlu1 %805 }
 0x7a1   :  { %v810_v40 = vsub.f32 %v802_v26, %v806_v38 }
 0x7a3   :  { %v812_v41 = vmul.f32 1.442695, %v810_v40 }
 0x7a5   :  { %4946 = vpow2.f32 %v812_v41 }
 0x7af   :  { %v4947_v42 = vpop.eup %4946 }
 0x7b0   :  { %v816_v43 = vsel %vm318_vm2, %v4947_v42, 0.0 }
 0x7b1   :  { %817 = vadd.xlane.f32.xlu0 %v816_v43 }
 0x7c7   :  { %826 = vrot.lane.b32.xlu0 %v5612_v36, %s5326_s22 }
 0x7cb   :  { %1396 = vrot.lane.b32.xlu0 %v5614_v39, %s5328_s2 }
 0x7cf   :  { %1557 = vrot.lane.b32.xlu0 %v5612_v36, %s5329_s8 }
 0x7d3   :  { %1635 = vrot.lane.b32.xlu0 %v5614_v39, %s5329_s8 }
 0x7d7   :  { %1555 = vrot.lane.b32.xlu0 %v5612_v36, %s5330_s30 }
 0x83e   :  { %v818_v44 = vpop.xlane.xlu0 %817 }
 0x83f   :  { %4948 = vrcp.f32 %v818_v44 }
 0x842   :  { %v827_v45 = vpop.permute.xlu0 %826 }
 0x843   :  { %4645 = vmatpush3.msra.mxu1 %v827_v45 }
 0x844   :  { %4654 = vmatprep.subr.mxu1 %v312_v59 }
 0x846   :  { %v1397_v46 = vpop.permute.xlu0 %1396 }
 0x847   :  { %4680 = vmatpush3.msra.mxu0 %v1397_v46 }
 0x848   :  { %4689 = vmatprep.subr.mxu0 %v5320_v15 }
 0x849   :  { %v4949_v47 = vpop.eup %4948 }
 0x84a   :  { %v824_v48 = vmul.f32 %v4949_v47, %v4947_v42  ;;  %v1558_v14 = vpop.permute.xlu0 %1557 }
 0x84c   :  { %4647 = vmatmul.mubr.msk.f32.vlgmr.msra.gmra.mrb[8].mxu1 %vm318_vm2, %v824_v48  ;;  %v974_v49 = vpop.f32.mrb[8].mxu0 }
 0x84d   :  { %v4653_v50 = vpop.f32.mrb[9].mxu0  ;;  %4655 = vmatpush3.msra.mxu1 %v312_v59  ;;  %v4406_v59 = vld [vmem:[#allocation8] ss:$0 sm:$0xff] }
 0x84e   :  { %4659 = vmatprep.subr.mxu1 %v311_v60  ;;  %v1636_v18 = vpop.permute.xlu0 %1635 }
 0x850   :  { %v1214_v51 = vpop.f32.mrb[10].mxu0 }
 0x851   :  { %v1296_v52 = vmul.f32 0.35355338, %v1214_v51  ;;  %v4668_v53 = vpop.f32.mrb[11].mxu0 }
 0x852   :  { %v1556_v20 = vpop.permute.xlu0 %1555 }
 0x853   :  { %v1298_v54 = vsel %vm318_vm2, %v1296_v52, -inf }
 0x854   :  { %1299 = vmax.xlane.f32.xlu1 %v1298_v54  ;;  %v1292_v55 = vpop.f32.mrb[12].mxu0 }
 0x855   :  { %v1297_v56 = vmul.f32 0.35355338, %v1292_v55  ;;  %v4673_v57 = vpop.f32.mrb[13].mxu0 }
 0x857   :  { %v1301_v58 = vsel %vm318_vm2, %v1297_v56, -inf }
 0x858   :  { %1302 = vmax.xlane.f32.xlu1 %v1301_v58 }
 0x8e1   :  { %v1300_v61 = vpop.xlane.xlu1 %1299 }
 0x8e2   :  { %v1304_v62 = vsub.f32 %v1296_v52, %v1300_v61 }
 0x8e4   :  { %v1306_v63 = vmul.f32 1.442695, %v1304_v62 }
 0x8e5   :  { %v1303_v0 = vpop.xlane.xlu1 %1302 }
 0x8e6   :  { %4950 = vpow2.f32 %v1306_v63  ;;  %v1305_v1 = vsub.f32 %v1297_v56, %v1303_v0 }
 0x8e8   :  { %v1308_v2 = vmul.f32 1.442695, %v1305_v1 }
 0x8ea   :  { %4952 = vpow2.f32 %v1308_v2 }
 0x8f0   :  { %v4951_v3 = vpop.eup %4950 }
 0x8f1   :  { %v1310_v4 = vsel %vm318_vm2, %v4951_v3, 0.0 }
 0x8f2   :  { %1311 = vadd.xlane.f32.xlu1 %v1310_v4 }
 0x8f4   :  { %v4953_v5 = vpop.eup %4952 }
 0x8f5   :  { %v1313_v6 = vsel %vm318_vm2, %v4953_v5, 0.0 }
 0x8f6   :  { %1314 = vadd.xlane.f32.xlu1 %v1313_v6 }
 0x907   :  { %1320 = vrot.lane.b32.xlu1 %v5612_v36, %s5328_s2 }
 0x90b   :  { %1633 = vrot.lane.b32.xlu1 %v5614_v39, %s5330_s30 }
 0x91f   :  { %v898_v7 = vpop.f32.mrb[8].mxu1 }
 0x920   :  { %v4648_v8 = vpop.f32.mrb[9].mxu1  ;;  %4656 = vmatprep.mubr.msk.f32.mxu1 %vm318_vm2, %v898_v7 }
 0x921   :  { %4657 = vmatmul.mubr.msk.f32.vlgmr.msra.gmra.mrb[10].mxu1 %vm318_vm2, %v974_v49 }
 0x922   :  { %4661 = vmatprep.mubr.msk.f32.mxu1 %vm318_vm2, %v5677_v16  ;;  %4660 = vmatpush3.msra.mxu1 %v311_v60 }
 0x923   :  { %4674 = vmatprep.subr.mxu1 %v5320_v15 }
 0x929   :  { %4662 = vmatmul.mubr.msk.f32.vlgmr.msra.gmra.mrb[10].mxu1 %vm318_vm2, %v5668_v9 }
 0x92a   :  { %4676 = vmatprep.mubr.msk.f32.mxu1 %vm5321_vm1, %v5320_v15 }
 0x97f   :  { %v1312_v10 = vpop.xlane.xlu1 %1311 }
 0x980   :  { %4954 = vrcp.f32 %v1312_v10 }
 0x983   :  { %v1315_v11 = vpop.xlane.xlu1 %1314 }
 0x984   :  { %4956 = vrcp.f32 %v1315_v11 }
 0x987   :  { %v1321_v13 = vpop.permute.xlu1 %1320 }
 0x988   :  { %4675 = vmatpush3.msra.mxu1 %v1321_v13 }
 0x989   :  { %4684 = vmatprep.subr.mxu1 %v313_v12 }
 0x98a   :  { %v4955_v16 = vpop.eup %4954 }
 0x98b   :  { %v1318_v17 = vmul.f32 %v4955_v16, %v4951_v3  ;;  %v1634_v25 = vpop.permute.xlu1 %1633 }
 0x98d   :  { %4677 = vmatmul.mubr.msk.f32.vlgmr.msra.gmra.mrb[12].mxu1 %vm318_vm2, %v1318_v17 }
 0x98e   :  { %v4957_v9 = vpop.eup %4956  ;;  %4685 = vmatpush3.msra.mxu1 %v313_v12 }
 0x98f   :  { %v1319_v19 = vmul.f32 %v4957_v9, %v4953_v5  ;;  %4694 = vmatprep.subr.mxu1 %v5320_v15 }
 0x991   :  { %4682 = vmatmul.mubr.msk.f32.vlgmr.msra.gmra.mrb[14].mxu0 %vm318_vm2, %v1319_v19 }
 0x992   :  { %4690 = vmatpush3.xpose.msk.msra.mxu0 %vm318_vm2, %v1558_v14  ;;  %4691 = vmatprep.mubr.msk.f32.mxu0 %vm5321_vm1, %v5320_v15  ;;  %v4915_v14 = vld [vmem:[#allocation13 + $0x8] sm:$0xff]  }
 0x993   :  { %4699 = vmatprep.subr.mxu0 %v5320_v15 }
 0x995   :  { %4692 = vmatmul.mubr.msk.f32.vlgmr.msra.gmra.mrb[16].mxu0 %vm318_vm2, %v1556_v20 }
 0x996   :  { %4701 = vmatprep.mubr.msk.f32.mxu0 %vm5321_vm1, %v5320_v15 }
 0xa60   :  { %v1392_v21 = vpop.f32.mrb[12].mxu1 }
 0xa61   :  { %v4678_v22 = vpop.f32.mrb[13].mxu1  ;;  %4686 = vmatprep.mubr.msk.f32.mxu1 %vm318_vm2, %v1392_v21 }
 0xa62   :  { %v4407_v22 = vld [vmem:[#allocation10] ss:$0 sm:$0xff] }
 0xa64   :  { %v1468_v23 = vpop.f32.mrb[14].mxu0 }
 0xa65   :  { %v4683_v24 = vpop.f32.mrb[15].mxu0  ;;  %4687 = vmatmul.mubr.msk.f32.vlgmr.msra.gmra.mrb[10].mxu1 %vm318_vm2, %v1468_v23 }
 0xa66   :  { %4695 = vmatpush3.xpose.msk.msra.mxu1 %vm318_vm2, %v1636_v18  ;;  %4696 = vmatprep.mubr.msk.f32.mxu1 %vm5321_vm1, %v5320_v15 }
 0xa67   :  { %4704 = vmatprep.subr.mxu1 %v5320_v15 }
 0xa68   :  { %v1629_v26 = vpop.f32.mrb[16].mxu0 }
 0xa69   :  { %v1711_v27 = vmul.f32 0.35355338, %v1629_v26  ;;  %v4693_v28 = vpop.f32.mrb[17].mxu0  ;;  %4697 = vmatmul.mubr.msk.f32.vlgmr.msra.gmra.mrb[14].mxu1 %vm318_vm2, %v1634_v25  ;;  %v4408_v26 = vld [vmem:[#allocation11] ss:$0 sm:$0xff] }
 0xa6a   :  { %4706 = vmatprep.mubr.msk.f32.mxu1 %vm5321_vm1, %v5320_v15 }
 0xa6b   :  { %v1713_v29 = vsel %vm318_vm2, %v1711_v27, -inf }
 0xa6c   :  { %1714 = vmax.xlane.f32.xlu0 %v1713_v29 }
 0xaf9   :  { %v1715_v30 = vpop.xlane.xlu0 %1714 }
 0xafa   :  { %v1719_v33 = vsub.f32 %v1711_v27, %v1715_v30 }
 0xafc   :  { %v1721_v34 = vmul.f32 1.442695, %v1719_v33 }
 0xafe   :  { %4958 = vpow2.f32 %v1721_v34  ;;  %v4916_v34 = vld [vmem:[%s6079_s11] sm:$0xff]  }
 0xb08   :  { %v4959_v35 = vpop.eup %4958 }
 0xb09   :  { %v1725_v37 = vsel %vm318_vm2, %v4959_v35, 0.0 }
 0xb0a   :  { %1726 = vadd.xlane.f32.xlu0 %v1725_v37  ;;  %v4918_v37 = vld [vmem:[%s6079_s11 + $0x10] sm:$0xff]  }
 0xb3c   :  { %v1707_v38 = vpop.f32.mrb[14].mxu1 }
 0xb3d   :  { %v1712_v40 = vmul.f32 0.35355338, %v1707_v38  ;;  %v4698_v41 = vpop.f32.mrb[15].mxu1  ;;  %v4919_v38 = vld [vmem:[%s6079_s11 + $0x18] sm:$0xff]  }
 0xb3f   :  { %v1716_v42 = vsel %vm318_vm2, %v1712_v40, -inf }
 0xb40   :  { %1717 = vmax.xlane.f32.xlu1 %v1716_v42 }
 0xb51   :  { %1811 = vrot.lane.b32.xlu1 %v5614_v39, %s5331_s26 }
 0xb97   :  { %v1727_v49 = vpop.xlane.xlu0 %1726 }
 0xbcd   :  { %v1718_v43 = vpop.xlane.xlu1 %1717 }
 0xbce   :  { %v1720_v44 = vsub.f32 %v1712_v40, %v1718_v43  ;;  %v4409_v40 = vld [vmem:[#allocation14] ss:$0 sm:$0xff] }
 0xbd0   :  { %v1723_v45 = vmul.f32 1.442695, %v1720_v44 }
 0xbd1   :  { %v1812_v46 = vpop.permute.xlu1 %1811 }
 0xbd2   :  { %4960 = vpow2.f32 %v1723_v45  ;;  %4705 = vmatpush3.msra.mxu1 %v1812_v46 }
 0xbd3   :  { %4962 = vrcp.f32 %v1727_v49 }
 0xbdc   :  { %v4961_v47 = vpop.eup %4960 }
 0xbdd   :  { %v1728_v48 = vsel %vm318_vm2, %v4961_v47, 0.0  ;;  %v4963_v51 = vpop.eup %4962 }
 0xbde   :  { %1729 = vadd.xlane.f32.xlu0 %v1728_v48  ;;  %v1733_v52 = vmul.f32 %v4963_v51, %v4959_v35  ;;  %v4917_v35 = vld [vmem:[%s6079_s11 + $0x8] sm:$0xff]  }
 0xbf4   :  { %1735 = vrot.lane.b32.xlu0 %v5612_v36, %s5331_s26  ;;  %v314_v36 = vld [vmem:[%s6073_s5 + $0x18] sm:$0xff] }
 0xbf5   :  { %4709 = vmatprep.subr.mxu1 %v314_v36 }
 0xc6b   :  { %v1730_v50 = vpop.xlane.xlu0 %1729 }
 0xc6c   :  { %4964 = vrcp.f32 %v1730_v50 }
 0xc6f   :  { %v1736_v39 = vpop.permute.xlu0 %1735 }
 0xc70   :  { %4700 = vmatpush3.msra.mxu0 %v1736_v39 }
 0xc71   :  { %4702 = vmatmul.mubr.msk.f32.vlgmr.msra.gmra.mrb[18].mxu0 %vm318_vm2, %v1733_v52  ;;  %4714 = vmatprep.subr.bf16.mxu0 %v5320_v15 }
 0xc72   :  { %4718 = vmatprep.mubr.msk.bf16.mxu0 %vm5321_vm1, %v5320_v15 }
 0xc76   :  { %v4965_v53 = vpop.eup %4964 }
 0xc77   :  { %v1734_v54 = vmul.f32 %v4965_v53, %v4961_v47 }
 0xc79   :  { %4707 = vmatmul.mubr.msk.f32.vlgmr.msra.gmra.mrb[16].mxu1 %vm318_vm2, %v1734_v54 }
 0xc7a   :  { %4710 = vmatpush3.msra.mxu1 %v314_v36 }
 0xc7b   :  { %4722 = vmatprep.subr.bf16.mxu1 %v5320_v15 }
 0xd44   :  { %v1807_v55 = vpop.f32.mrb[18].mxu0 }
 0xd45   :  { %v4703_v56 = vpop.f32.mrb[19].mxu0  ;;  %4711 = vmatprep.mubr.msk.f32.mxu1 %vm318_vm2, %v1807_v55 }
 0xd4c   :  { %v1883_v57 = vpop.f32.mrb[16].mxu1 }
 0xd4d   :  { %v4708_v58 = vpop.f32.mrb[17].mxu1  ;;  %4712 = vmatmul.mubr.msk.f32.vlgmr.msra.gmra.mrb[10].mxu1 %vm318_vm2, %v1883_v57 }
 0xd4e   :  { %4730 = vmatprep.mubr.msk.bf16.mxu1 %vm5321_vm1, %v5320_v15  ;;  %4723 = vmatpush3.bf16.msra.mxu1 %v4916_v34 }
 0xd4f   :  { %4724 = vmatprep.subr.bf16.mxu1 %v5320_v15 }
 0xd52   :  { %4725 = vmatpush3.bf16.msra.mxu1 %v4917_v35 }
 0xd53   :  { %4726 = vmatprep.subr.bf16.mxu1 %v5320_v15 }
 0xd56   :  { %4727 = vmatpush3.bf16.msra.mxu1 %v4918_v37  ;;  %v4420_v37 = vld [vmem:[%s6082_s14] ss:$0 sm:$0xff] }
 0xd57   :  { %4728 = vmatprep.subr.bf16.mxu1 %v5320_v15 }
 0xd5a   :  { %4729 = vmatpush3.bf16.msra.mxu1 %v4919_v38 }
 0xd5b   :  { %4752 = vmatprep.subr.mxu1 %v5320_v15 }
 0xe20   :  { %v4713_v60 = vpop.f32.mrb[10].mxu1 }
 0xe21   :  { %v1978_v61 = vadd.f32 %v4713_v60, %v4406_v59  ;;  %v1959_v62 = vpop.f32.mrb[11].mxu1 }
 0xe22   :  { %v1977_v63 = vadd.f32 %v4406_v59, %v1959_v62 }
 0xe23   :  { %v1980_v0 = vadd.f32 %v1978_v61, %v5605_v32 }
 0xe24   :  { %v1979_v1 = vadd.f32 %v1977_v63, %v5603_v31  ;;  %v4914_v31 = vld [vmem:[#allocation13] sm:$0xff]  }
 0xe25   :  { %v1986_v2 = vsel %vm199_vm0, %v1980_v0, 0.0  ;;  %4715 = vmatpush3.bf16.msra.mxu0 %v4914_v31 }
 0xe26   :  { %1987 = vadd.xlane.f32.xlu0 %v1986_v2  ;;  %v1983_v3 = vsel %vm199_vm0, %v1979_v1, 0.0  ;;  %4716 = vmatprep.subr.bf16.mxu0 %v5320_v15 }
 0xe27   :  { %1984 = vadd.xlane.f32.xlu1 %v1983_v3 }
 0xe29   :  { %4717 = vmatpush3.bf16.msra.mxu0 %v4915_v14 }
 0xe2a   :  { %4734 = vmatprep.subr.bf16.mxu0 %v5320_v15 }
 0xeb3   :  { %v1988_v4 = vpop.xlane.xlu0 %1987 }
 0xeb4   :  { %v1990_v5 = vmul.f32 0.03125, %v1988_v4  ;;  %v1985_v6 = vpop.xlane.xlu1 %1984 }
 0xeb5   :  { %v1989_v7 = vmul.f32 0.03125, %v1985_v6 }
 0xeb6   :  { %v1992_v8 = vsub.f32 %v1980_v0, %v1990_v5  ;;  %v4413_v0 = vld [vmem:[#allocation16] ss:$0 sm:$0xff] }
 0xeb7   :  { %v1991_v10 = vsub.f32 %v1979_v1, %v1989_v7 }
 0xeb8   :  { %v1994_v11 = vmul.f32 %v1992_v8, %v1992_v8 }
 0xeb9   :  { %v1993_v12 = vmul.f32 %v1991_v10, %v1991_v10 }
 0xeba   :  { %v1998_v13 = vsel %vm199_vm0, %v1994_v11, 0.0 }
 0xebb   :  { %1999 = vadd.xlane.f32.xlu1 %v1998_v13  ;;  %v1995_v32 = vsel %vm199_vm0, %v1993_v12, 0.0 }
 0xebc   :  { %1996 = vadd.xlane.f32.xlu0 %v1995_v32 }
 0xf48   :  { %v2000_v16 = vpop.xlane.xlu1 %1999 }
 0xf49   :  { %v2002_v17 = vmul.f32 0.03125, %v2000_v16  ;;  %v1997_v9 = vpop.xlane.xlu0 %1996 }
 0xf4a   :  { %v2001_v18 = vmul.f32 0.03125, %v1997_v9 }
 0xf4b   :  { %v2004_v19 = vadd.f32 1e-12, %v2002_v17 }
 0xf4c   :  { %v2003_v20 = vadd.f32 1e-12, %v2001_v18 }
 0xf4d   :  { %4966 = vrsqrt.f32 %v2004_v19 }
 0xf4e   :  { %4968 = vrsqrt.f32 %v2003_v20  ;;  %v4920_v20 = vld [vmem:[%s6071_s3 + $0x10] sm:$0xff]  }
 0xf57   :  { %v4967_v21 = vpop.eup %4966 }
 0xf58   :  { %v4969_v23 = vpop.eup %4968  ;;  %v2008_v24 = vmul.f32 %v4967_v21, %v1992_v8  ;;  %v4921_v21 = vld [vmem:[%s6071_s3 + $0x18] sm:$0xff]  }
 0xf59   :  { %v2007_v25 = vmul.f32 %v4969_v23, %v1991_v10 }
 0xf5a   :  { %v2016_v27 = vmul.f32 %v4407_v22, %v2008_v24 }
 0xf5b   :  { %v2015_v28 = vmul.f32 %v4407_v22, %v2007_v25 }
 0xf5c   :  { %v2024_v29 = vadd.f32 %v4408_v26, %v2016_v27 }
 0xf5d   :  { %v2023_v30 = vadd.f32 %v4408_v26, %v2015_v28 }
 0xf5f   :  { %v2025_v33 = vpack.c.bf16 %v2024_v29, %v2023_v30 }
 0xf61   :  { %4719 = vmatmul.mubr.msk.bf16.vlgmr.msra.gmra.mrb[20].mxu0 %vm199_vm0, %v2025_v33 }
 0xf62   :  { %4738 = vmatprep.mubr.msk.bf16.mxu0 %vm5321_vm1, %v5320_v15  ;;  %4735 = vmatpush3.bf16.msra.mxu0 %v4920_v20 }
 0xf63   :  { %4736 = vmatprep.subr.bf16.mxu0 %v5320_v15 }
 0xf66   :  { %4737 = vmatpush3.bf16.msra.mxu0 %v4921_v21 }
 0xf67   :  { %4742 = vmatprep.subr.mxu0 %v5320_v15 }
0x1034   :  { %v2086_v41 = vpop.f32.mrb[20].mxu0 }
0x1035   :  { %v2087_v42 = vadd.f32 %v4409_v40, %v2086_v41  ;;  %v4720_v43 = vpop.f32.mrb[21].mxu0 }
0x1036   :  { %v2089_v44 = vpop.f32.mrb[22].mxu0  ;;  %v4425_v43 = vld [vmem:[#allocation7 + $0x1] ss:$0 sm:$0xff] }
0x1037   :  { %v2095_v45 = vmul.f32 0.044715, %v2087_v42  ;;  %v2090_v46 = vadd.f32 %v4409_v40, %v2089_v44  ;;  %v4721_v47 = vpop.f32.mrb[23].mxu0  ;;  %v2093_v58 = vmul.f32 0.5, %v2087_v42 }
0x1039   :  { %v2097_v48 = vmul.f32 %v2095_v45, %v2087_v42  ;;  %v2096_v49 = vmul.f32 0.044715, %v2090_v46  ;;  %v2094_v59 = vmul.f32 0.5, %v2090_v46 }
0x103b   :  { %v2099_v50 = vmul.f32 %v2097_v48, %v2087_v42  ;;  %v2098_v51 = vmul.f32 %v2096_v49, %v2090_v46 }
0x103d   :  { %v2101_v52 = vadd.f32 %v2099_v50, %v2087_v42  ;;  %v2100_v39 = vmul.f32 %v2098_v51, %v2090_v46 }
0x103f   :  { %v2103_v53 = vmul.f32 0.7978846, %v2101_v52  ;;  %v2102_v54 = vadd.f32 %v2100_v39, %v2090_v46 }
0x1041   :  { %4970 = vtanh.f32 %v2103_v53  ;;  %v2104_v36 = vmul.f32 0.7978846, %v2102_v54 }
0x1043   :  { %4972 = vtanh.f32 %v2104_v36 }
0x104b   :  { %v4971_v55 = vpop.eup %4970 }
0x104c   :  { %v2107_v56 = vadd.f32 1.0, %v4971_v55 }
0x104d   :  { %v4973_v57 = vpop.eup %4972 }
0x104e   :  { %v2108_v60 = vadd.f32 1.0, %v4973_v57  ;;  %v2109_v61 = vmul.f32 %v2107_v56, %v2093_v58 }
0x1050   :  { %v2110_v62 = vmul.f32 %v2108_v60, %v2094_v59 }
0x1052   :  { %v2111_v63 = vpack.c.bf16 %v2110_v62, %v2109_v61 }
0x1054   :  { %4731 = vmatmul.mubr.msk.bf16.vlgmr.msra.gmra.mrb[20].mxu1 %vm2151_vm3, %v2111_v63 }
0x1055   :  { %4754 = vmatprep.mubr.msk.f32.mxu1 %vm5321_vm1, %v5320_v15 }
0x1127   :  { %v2189_v1 = vpop.f32.mrb[20].mxu1 }
0x1128   :  { %v2190_v2 = vadd.f32 %v4413_v0, %v2189_v1  ;;  %v4732_v3 = vpop.f32.mrb[21].mxu1 }
0x1129   :  { %v2192_v4 = vpop.f32.mrb[22].mxu1 }
0x112a   :  { %v2193_v5 = vadd.f32 %v4413_v0, %v2192_v4  ;;  %v4733_v6 = vpop.f32.mrb[23].mxu1  ;;  %v2196_v7 = vadd.f32 %v2190_v2, %v2023_v30 }
0x112c   :  { %v2200_v8 = vsel %vm199_vm0, %v2196_v7, 0.0  ;;  %v2197_v10 = vadd.f32 %v2193_v5, %v2024_v29  ;;  %v4419_v29 = vld [vmem:[#allocation17] ss:$0 sm:$0xff] }
0x112d   :  { %2201 = vadd.xlane.f32.xlu0 %v2200_v8 }
0x112e   :  { %v2203_v11 = vsel %vm199_vm0, %v2197_v10, 0.0 }
0x112f   :  { %2204 = vadd.xlane.f32.xlu1 %v2203_v11 }
0x11ba   :  { %v2202_v12 = vpop.xlane.xlu0 %2201 }
0x11bb   :  { %v2206_v13 = vmul.f32 0.03125, %v2202_v12 }
0x11bc   :  { %v2205_v32 = vpop.xlane.xlu1 %2204 }
0x11bd   :  { %v2208_v31 = vsub.f32 %v2196_v7, %v2206_v13  ;;  %v2207_v14 = vmul.f32 0.03125, %v2205_v32 }
0x11bf   :  { %v2209_v16 = vsub.f32 %v2197_v10, %v2207_v14  ;;  %v2210_v17 = vmul.f32 %v2208_v31, %v2208_v31 }
0x11c1   :  { %v2212_v9 = vsel %vm199_vm0, %v2210_v17, 0.0  ;;  %v2211_v18 = vmul.f32 %v2209_v16, %v2209_v16 }
0x11c2   :  { %2213 = vadd.xlane.f32.xlu0 %v2212_v9 }
0x11c3   :  { %v2215_v19 = vsel %vm199_vm0, %v2211_v18, 0.0 }
0x11c4   :  { %2216 = vadd.xlane.f32.xlu1 %v2215_v19 }
0x124f   :  { %v2214_v22 = vpop.xlane.xlu0 %2213 }
0x1250   :  { %v2218_v23 = vmul.f32 0.03125, %v2214_v22 }
0x1251   :  { %v2217_v24 = vpop.xlane.xlu1 %2216 }
0x1252   :  { %v2220_v25 = vadd.f32 1e-12, %v2218_v23  ;;  %v2219_v26 = vmul.f32 0.03125, %v2217_v24 }
0x1254   :  { %4974 = vrsqrt.f32 %v2220_v25  ;;  %v2221_v27 = vadd.f32 1e-12, %v2219_v26 }
0x1256   :  { %4976 = vrsqrt.f32 %v2221_v27 }
0x125e   :  { %v4975_v28 = vpop.eup %4974 }
0x125f   :  { %v2224_v30 = vmul.f32 %v4975_v28, %v2208_v31 }
0x1260   :  { %v4977_v33 = vpop.eup %4976 }
0x1261   :  { %v2232_v34 = vmul.f32 %v4419_v29, %v2224_v30  ;;  %v2225_v35 = vmul.f32 %v4977_v33, %v2209_v16 }
0x1263   :  { %v2233_v38 = vmul.f32 %v4419_v29, %v2225_v35  ;;  %v5821_v40 = vadd.f32 %v4420_v37, %v2232_v34 }
0x1265   :  { %v5823_v41 = vadd.f32 %v4420_v37, %v2233_v38 }
0x1267   :  { %v2242_v42 = vpack.c.bf16 %v5823_v41, %v5821_v40 }
0x1269   :  { %4739 = vmatmul.mubr.msk.bf16.vlgmr.msra.gmra.mrb[24].mxu0 %vm199_vm0, %v2242_v42 }
0x126a   :  { %4744 = vmatprep.mubr.msk.f32.mxu0 %vm5321_vm1, %v5320_v15 }
0x133c   :  { %v2305_v44 = vpop.f32.mrb[24].mxu0 }
0x133d   :  { %v5830_v45 = vadd.f32 %v4425_v43, %v2305_v44  ;;  %v4740_v46 = vpop.f32.mrb[25].mxu0 }
0x133e   :  { %v2308_v47 = vpop.f32.mrb[26].mxu0 }
0x133f   :  { %v5832_v48 = vadd.f32 %v4425_v43, %v2308_v47  ;;  %2318 = vrot.lane.b32.xlu0 %v5830_v45, %s5322_s9  ;;  %v4741_v49 = vpop.f32.mrb[27].mxu0 }
0x1341   :  { %2395 = vrot.lane.b32.xlu1 %v5832_v48, %s5322_s9 }
0x13b1   :  { %v2319_v50 = vpop.permute.xlu0 %2318 }
0x13b2   :  { %4743 = vmatpush3.xpose.msk.msra.mxu0 %vm318_vm2, %v2319_v50 }
0x13b3   :  { %4747 = vmatprep.subr.mxu0 %v5320_v15  ;;  %v2396_v51 = vpop.permute.xlu1 %2395 }
0x13b5   :  { %4745 = vmatmul.mubr.msk.f32.vlgmr.msra.gmra.mrb[28].mxu0 %vm318_vm2, %v5830_v45 }
0x13b6   :  { %4748 = vmatpush3.xpose.msk.msra.mxu0 %vm318_vm2, %v2396_v51  ;;  %4749 = vmatprep.mubr.msk.f32.mxu0 %vm5321_vm1, %v5320_v15 }
0x13b7   :  { %4757 = vmatprep.subr.mxu0 %v5320_v15 }
0x13b9   :  { %4750 = vmatmul.mubr.msk.f32.vlgmr.msra.gmra.mrb[30].mxu0 %vm318_vm2, %v5832_v48 }
0x13ba   :  { %4759 = vmatprep.mubr.msk.f32.mxu0 %vm5321_vm1, %v5320_v15 }
0x1488   :  { %v2390_v52 = vpop.f32.mrb[28].mxu0 }
0x1489   :  { %v4746_v39 = vpop.f32.mrb[29].mxu0  ;;  %v2471_v56 = vmul.f32 0.35355338, %v2390_v52 }
0x148b   :  { %v2473_v57 = vsel %vm318_vm2, %v2471_v56, -inf }
0x148c   :  { %v2467_v53 = vpop.f32.mrb[30].mxu0 }
0x148d   :  { %v2472_v54 = vmul.f32 0.35355338, %v2467_v53  ;;  %v4751_v36 = vpop.f32.mrb[31].mxu0 }
0x148f   :  { %v2476_v55 = vsel %vm318_vm2, %v2472_v54, -inf }
0x1490   :  { %2477 = vmax.xlane.f32.xlu1 %v2476_v55 }
0x14a1   :  { %2727 = vrot.lane.b32.xlu1 %v5832_v48, %s5323_s29 }
0x14a5   :  { %2725 = vrot.lane.b32.xlu1 %v5832_v48, %s5324_s28 }
0x14c9   :  { %2474 = vmax.xlane.f32.xlu1 %v2473_v57 }
0x14da   :  { %2649 = vrot.lane.b32.xlu1 %v5830_v45, %s5323_s29 }
0x14de   :  { %2647 = vrot.lane.b32.xlu1 %v5830_v45, %s5324_s28 }
0x14e2   :  { %3143 = vrot.lane.b32.xlu1 %v5830_v45, %s5325_s21 }
0x151d   :  { %v2478_v58 = vpop.xlane.xlu1 %2477 }
0x151e   :  { %v2480_v59 = vsub.f32 %v2472_v54, %v2478_v58 }
0x1520   :  { %v2483_v60 = vmul.f32 1.442695, %v2480_v59 }
0x1521   :  { %v2728_v63 = vpop.permute.xlu1 %2727 }
0x1522   :  { %4978 = vpow2.f32 %v2483_v60 }
0x1525   :  { %v2726_v0 = vpop.permute.xlu1 %2725 }
0x152c   :  { %v4979_v61 = vpop.eup %4978 }
0x152d   :  { %v2488_v62 = vsel %vm318_vm2, %v4979_v61, 0.0 }
0x152e   :  { %2489 = vadd.xlane.f32.xlu0 %v2488_v62 }
0x1544   :  { %2571 = vrot.lane.b32.xlu0 %v5832_v48, %s5316_s7 }
0x1556   :  { %v2475_v1 = vpop.xlane.xlu1 %2474 }
0x1557   :  { %v2479_v2 = vsub.f32 %v2471_v56, %v2475_v1 }
0x1559   :  { %v2481_v3 = vmul.f32 1.442695, %v2479_v2  ;;  %v4430_v2 = vld [vmem:[%s6073_s5 + $0x28] sm:$0xff] }
0x155a   :  { %v2650_v32 = vpop.permute.xlu1 %2649 }
0x155b   :  { %4980 = vpow2.f32 %v2481_v3  ;;  %v4429_v3 = vld [vmem:[%s6073_s5 + $0x20] sm:$0xff] }
0x155e   :  { %v2648_v14 = vpop.permute.xlu1 %2647 }
0x1562   :  { %v3144_v35 = vpop.permute.xlu1 %3143 }
0x1565   :  { %v4981_v4 = vpop.eup %4980 }
0x1566   :  { %v2485_v5 = vsel %vm318_vm2, %v4981_v4, 0.0 }
0x1567   :  { %2486 = vadd.xlane.f32.xlu0 %v2485_v5 }
0x157d   :  { %2495 = vrot.lane.b32.xlu0 %v5830_v45, %s5316_s7 }
0x15bb   :  { %v2490_v6 = vpop.xlane.xlu0 %2489 }
0x15bc   :  { %4982 = vrcp.f32 %v2490_v6 }
0x15bf   :  { %v2572_v7 = vpop.permute.xlu0 %2571 }
0x15c0   :  { %4758 = vmatpush3.msra.mxu0 %v2572_v7 }
0x15c1   :  { %4767 = vmatprep.subr.mxu0 %v5320_v15 }
0x15c6   :  { %v4983_v8 = vpop.eup %4982 }
0x15c7   :  { %v2494_v10 = vmul.f32 %v4983_v8, %v4979_v61 }
0x15c9   :  { %4760 = vmatmul.mubr.msk.f32.vlgmr.msra.gmra.mrb[32].mxu0 %vm318_vm2, %v2494_v10 }
0x15ca   :  { %4768 = vmatpush3.xpose.msk.msra.mxu0 %vm318_vm2, %v2728_v63  ;;  %4769 = vmatprep.mubr.msk.f32.mxu0 %vm5321_vm1, %v5320_v15 }
0x15cb   :  { %4777 = vmatprep.subr.mxu0 %v5320_v15 }
0x15cd   :  { %4770 = vmatmul.mubr.msk.f32.vlgmr.msra.gmra.mrb[34].mxu0 %vm318_vm2, %v2726_v0 }
0x15ce   :  { %4779 = vmatprep.mubr.msk.f32.mxu0 %vm5321_vm1, %v5320_v15 }
0x15f4   :  { %v2487_v11 = vpop.xlane.xlu0 %2486 }
0x15f5   :  { %4984 = vrcp.f32 %v2487_v11 }
0x15f8   :  { %v2496_v12 = vpop.permute.xlu0 %2495 }
0x15f9   :  { %4753 = vmatpush3.msra.mxu1 %v2496_v12 }
0x15fa   :  { %4762 = vmatprep.subr.mxu1 %v5320_v15 }
0x15ff   :  { %v4985_v13 = vpop.eup %4984 }
0x1600   :  { %v2493_v31 = vmul.f32 %v4985_v13, %v4981_v4 }
0x1602   :  { %4755 = vmatmul.mubr.msk.f32.vlgmr.msra.gmra.mrb[18].mxu1 %vm318_vm2, %v2493_v31 }
0x1603   :  { %4763 = vmatpush3.xpose.msk.msra.mxu1 %vm318_vm2, %v2650_v32  ;;  %4764 = vmatprep.mubr.msk.f32.mxu1 %vm5321_vm1, %v5320_v15 }
0x1604   :  { %4772 = vmatprep.subr.mxu1 %v5320_v15 }
0x1606   :  { %4765 = vmatmul.mubr.msk.f32.vlgmr.msra.gmra.mrb[24].mxu1 %vm318_vm2, %v2648_v14 }
0x1607   :  { %4774 = vmatprep.mubr.msk.f32.mxu1 %vm5321_vm1, %v5320_v15 }
0x169c   :  { %v5886_v16 = vpop.f32.mrb[32].mxu0 }
0x169d   :  { %v4761_v17 = vpop.f32.mrb[33].mxu0 }
0x16a0   :  { %v2799_v9 = vpop.f32.mrb[34].mxu0 }
0x16a1   :  { %v2804_v18 = vmul.f32 0.35355338, %v2799_v9  ;;  %v4771_v19 = vpop.f32.mrb[35].mxu0 }
0x16a3   :  { %v2808_v20 = vsel %vm318_vm2, %v2804_v18, -inf }
0x16a4   :  { %2809 = vmax.xlane.f32.xlu0 %v2808_v20 }
0x16ba   :  { %2903 = vrot.lane.b32.xlu0 %v5832_v48, %s5326_s22 }
0x16be   :  { %3141 = vrot.lane.b32.xlu0 %v5830_v45, %s5327_s4 }
0x16c2   :  { %3219 = vrot.lane.b32.xlu0 %v5832_v48, %s5327_s4 }
0x16d5   :  { %v5895_v21 = vpop.f32.mrb[18].mxu1 }
0x16d6   :  { %v4756_v22 = vpop.f32.mrb[19].mxu1 }
0x16d9   :  { %v2721_v23 = vpop.f32.mrb[24].mxu1 }
0x16da   :  { %v4766_v24 = vpop.f32.mrb[25].mxu1  ;;  %v2803_v33 = vmul.f32 0.35355338, %v2721_v23 }
0x16dc   :  { %v2805_v34 = vsel %vm318_vm2, %v2803_v33, -inf }
0x1731   :  { %v2810_v25 = vpop.xlane.xlu0 %2809 }
0x1732   :  { %v2812_v26 = vsub.f32 %v2804_v18, %v2810_v25  ;;  %v4431_v18 = vld [vmem:[%s6073_s5 + $0x30] sm:$0xff] }
0x1734   :  { %v2815_v27 = vmul.f32 1.442695, %v2812_v26 }
0x1735   :  { %v2904_v28 = vpop.permute.xlu0 %2903 }
0x1736   :  { %4986 = vpow2.f32 %v2815_v27  ;;  %4778 = vmatpush3.msra.mxu0 %v2904_v28 }
0x1737   :  { %4792 = vmatprep.subr.mxu0 %v5320_v15 }
0x1739   :  { %v3142_v43 = vpop.permute.xlu0 %3141 }
0x173d   :  { %v3220_v46 = vpop.permute.xlu0 %3219 }
0x1740   :  { %v4987_v29 = vpop.eup %4986 }
0x1741   :  { %v2820_v30 = vsel %vm318_vm2, %v4987_v29, 0.0 }
0x1742   :  { %2821 = vadd.xlane.f32.xlu1 %v2820_v30 }
0x1753   :  { %3221 = vrot.lane.b32.xlu1 %v5832_v48, %s5325_s21 }
0x1777   :  { %2806 = vmax.xlane.f32.xlu1 %v2805_v34 }
0x17cf   :  { %v2822_v37 = vpop.xlane.xlu1 %2821 }
0x17d0   :  { %4988 = vrcp.f32 %v2822_v37 }
0x17d3   :  { %v3222_v44 = vpop.permute.xlu1 %3221 }
0x17da   :  { %v4989_v38 = vpop.eup %4988 }
0x17db   :  { %v2826_v42 = vmul.f32 %v4989_v38, %v4987_v29 }
0x17dd   :  { %4780 = vmatmul.mubr.msk.f32.vlgmr.msra.gmra.mrb[36].mxu0 %vm318_vm2, %v2826_v42 }
0x17de   :  { %4793 = vmatpush3.xpose.msk.msra.mxu0 %vm318_vm2, %v3144_v35  ;;  %4794 = vmatprep.mubr.msk.f32.mxu0 %vm5321_vm1, %v5320_v15 }
0x17df   :  { %4797 = vmatprep.subr.mxu0 %v5320_v15 }
0x17e1   :  { %4795 = vmatmul.mubr.msk.f32.vlgmr.msra.gmra.mrb[38].mxu0 %vm318_vm2, %v3142_v43 }
0x17e2   :  { %4798 = vmatpush3.xpose.msk.msra.mxu0 %vm318_vm2, %v3222_v44  ;;  %4799 = vmatprep.mubr.msk.f32.mxu0 %vm5321_vm1, %v5320_v15 }
0x17e3   :  { %4807 = vmatprep.subr.mxu0 %v5320_v15 }
0x17e5   :  { %4800 = vmatmul.mubr.msk.f32.vlgmr.msra.gmra.mrb[40].mxu0 %vm318_vm2, %v3220_v46 }
0x17e6   :  { %4809 = vmatprep.mubr.msk.f32.mxu0 %vm5321_vm1, %v5320_v15 }
0x1804   :  { %v2807_v47 = vpop.xlane.xlu1 %2806 }
0x1805   :  { %v2811_v49 = vsub.f32 %v2803_v33, %v2807_v47 }
0x1807   :  { %v2813_v50 = vmul.f32 1.442695, %v2811_v49 }
0x1809   :  { %4990 = vpow2.f32 %v2813_v50 }
0x1813   :  { %v4991_v51 = vpop.eup %4990 }
0x1814   :  { %v2817_v52 = vsel %vm318_vm2, %v4991_v51, 0.0 }
0x1815   :  { %2818 = vadd.xlane.f32.xlu0 %v2817_v52 }
0x182b   :  { %2827 = vrot.lane.b32.xlu0 %v5830_v45, %s5326_s22 }
0x182f   :  { %3397 = vrot.lane.b32.xlu0 %v5832_v48, %s5328_s2 }
0x1833   :  { %3558 = vrot.lane.b32.xlu0 %v5830_v45, %s5329_s8 }
0x1837   :  { %3636 = vrot.lane.b32.xlu0 %v5832_v48, %s5329_s8 }
0x183b   :  { %3556 = vrot.lane.b32.xlu0 %v5830_v45, %s5330_s30 }
0x18a2   :  { %v2819_v39 = vpop.xlane.xlu0 %2818 }
0x18a3   :  { %4992 = vrcp.f32 %v2819_v39 }
0x18a6   :  { %v2828_v53 = vpop.permute.xlu0 %2827 }
0x18a7   :  { %4773 = vmatpush3.msra.mxu1 %v2828_v53 }
0x18a8   :  { %4782 = vmatprep.subr.mxu1 %v4430_v2 }
0x18aa   :  { %v3398_v54 = vpop.permute.xlu0 %3397 }
0x18ab   :  { %4808 = vmatpush3.msra.mxu0 %v3398_v54 }
0x18ac   :  { %4817 = vmatprep.subr.mxu0 %v5320_v15 }
0x18ad   :  { %v4993_v36 = vpop.eup %4992 }
0x18ae   :  { %v2825_v55 = vmul.f32 %v4993_v36, %v4991_v51  ;;  %v3559_v20 = vpop.permute.xlu0 %3558 }
0x18b0   :  { %4775 = vmatmul.mubr.msk.f32.vlgmr.msra.gmra.mrb[26].mxu1 %vm318_vm2, %v2825_v55  ;;  %v2975_v56 = vpop.f32.mrb[36].mxu0 }
0x18b1   :  { %v4781_v57 = vpop.f32.mrb[37].mxu0  ;;  %4783 = vmatpush3.msra.mxu1 %v4430_v2  ;;  %v4465_v2 = vld [vmem:[#allocation8 + $0x1] ss:$0 sm:$0xff] }
0x18b2   :  { %4787 = vmatprep.subr.mxu1 %v4429_v3  ;;  %v3637_v23 = vpop.permute.xlu0 %3636 }
0x18b4   :  { %v3215_v58 = vpop.f32.mrb[38].mxu0 }
0x18b5   :  { %v3297_v59 = vmul.f32 0.35355338, %v3215_v58  ;;  %v4796_v60 = vpop.f32.mrb[39].mxu0 }
0x18b6   :  { %v3557_v25 = vpop.permute.xlu0 %3556 }
0x18b7   :  { %v3299_v61 = vsel %vm318_vm2, %v3297_v59, -inf }
0x18b8   :  { %3300 = vmax.xlane.f32.xlu1 %v3299_v61  ;;  %v3293_v62 = vpop.f32.mrb[40].mxu0 }
0x18b9   :  { %v3298_v63 = vmul.f32 0.35355338, %v3293_v62  ;;  %v4801_v0 = vpop.f32.mrb[41].mxu0 }
0x18bb   :  { %v3302_v1 = vsel %vm318_vm2, %v3298_v63, -inf }
0x18bc   :  { %3303 = vmax.xlane.f32.xlu1 %v3302_v1 }
0x1945   :  { %v3301_v4 = vpop.xlane.xlu1 %3300 }
0x1946   :  { %v3305_v5 = vsub.f32 %v3297_v59, %v3301_v4 }
0x1948   :  { %v3307_v6 = vmul.f32 1.442695, %v3305_v5 }
0x1949   :  { %v3304_v7 = vpop.xlane.xlu1 %3303 }
0x194a   :  { %4994 = vpow2.f32 %v3307_v6  ;;  %v3306_v8 = vsub.f32 %v3298_v63, %v3304_v7 }
0x194c   :  { %v3309_v10 = vmul.f32 1.442695, %v3306_v8 }
0x194e   :  { %4996 = vpow2.f32 %v3309_v10 }
0x1954   :  { %v4995_v11 = vpop.eup %4994 }
0x1955   :  { %v3311_v12 = vsel %vm318_vm2, %v4995_v11, 0.0 }
0x1956   :  { %3312 = vadd.xlane.f32.xlu1 %v3311_v12 }
0x1958   :  { %v4997_v13 = vpop.eup %4996 }
0x1959   :  { %v3314_v32 = vsel %vm318_vm2, %v4997_v13, 0.0 }
0x195a   :  { %3315 = vadd.xlane.f32.xlu1 %v3314_v32 }
0x196b   :  { %3321 = vrot.lane.b32.xlu1 %v5830_v45, %s5328_s2 }
0x196f   :  { %3634 = vrot.lane.b32.xlu1 %v5832_v48, %s5330_s30 }
0x1983   :  { %v2899_v31 = vpop.f32.mrb[26].mxu1 }
0x1984   :  { %v4776_v14 = vpop.f32.mrb[27].mxu1  ;;  %4784 = vmatprep.mubr.msk.f32.mxu1 %vm318_vm2, %v2899_v31 }
0x1985   :  { %4785 = vmatmul.mubr.msk.f32.vlgmr.msra.gmra.mrb[28].mxu1 %vm318_vm2, %v2975_v56 }
0x1986   :  { %4789 = vmatprep.mubr.msk.f32.mxu1 %vm318_vm2, %v5895_v21  ;;  %4788 = vmatpush3.msra.mxu1 %v4429_v3 }
0x1987   :  { %4802 = vmatprep.subr.mxu1 %v5320_v15 }
0x198d   :  { %4790 = vmatmul.mubr.msk.f32.vlgmr.msra.gmra.mrb[28].mxu1 %vm318_vm2, %v5886_v16 }
0x198e   :  { %4804 = vmatprep.mubr.msk.f32.mxu1 %vm5321_vm1, %v5320_v15 }
0x19e3   :  { %v3313_v17 = vpop.xlane.xlu1 %3312 }
0x19e4   :  { %4998 = vrcp.f32 %v3313_v17 }
0x19e7   :  { %v3316_v9 = vpop.xlane.xlu1 %3315 }
0x19e8   :  { %5000 = vrcp.f32 %v3316_v9 }
0x19eb   :  { %v3322_v19 = vpop.permute.xlu1 %3321 }
0x19ec   :  { %4803 = vmatpush3.msra.mxu1 %v3322_v19 }
0x19ed   :  { %4812 = vmatprep.subr.mxu1 %v4431_v18 }
0x19ee   :  { %v4999_v21 = vpop.eup %4998 }
0x19ef   :  { %v3319_v22 = vmul.f32 %v4999_v21, %v4995_v11  ;;  %v3635_v30 = vpop.permute.xlu1 %3634 }
0x19f1   :  { %4805 = vmatmul.mubr.msk.f32.vlgmr.msra.gmra.mrb[30].mxu1 %vm318_vm2, %v3319_v22 }
0x19f2   :  { %v5001_v16 = vpop.eup %5000  ;;  %4813 = vmatpush3.msra.mxu1 %v4431_v18 }
0x19f3   :  { %v3320_v24 = vmul.f32 %v5001_v16, %v4997_v13  ;;  %4822 = vmatprep.subr.mxu1 %v5320_v15 }
0x19f5   :  { %4810 = vmatmul.mubr.msk.f32.vlgmr.msra.gmra.mrb[42].mxu0 %vm318_vm2, %v3320_v24 }
0x19f6   :  { %4818 = vmatpush3.xpose.msk.msra.mxu0 %vm318_vm2, %v3559_v20  ;;  %4819 = vmatprep.mubr.msk.f32.mxu0 %vm5321_vm1, %v5320_v15  ;;  %v4923_v20 = vld [vmem:[#allocation13 + $0x18] sm:$0xff]  }
0x19f7   :  { %4827 = vmatprep.subr.mxu0 %v5320_v15 }
0x19f9   :  { %4820 = vmatmul.mubr.msk.f32.vlgmr.msra.gmra.mrb[44].mxu0 %vm318_vm2, %v3557_v25 }
0x19fa   :  { %4829 = vmatprep.mubr.msk.f32.mxu0 %vm5321_vm1, %v5320_v15 }
0x1ac4   :  { %v3393_v26 = vpop.f32.mrb[30].mxu1 }
0x1ac5   :  { %v4806_v27 = vpop.f32.mrb[31].mxu1  ;;  %4814 = vmatprep.mubr.msk.f32.mxu1 %vm318_vm2, %v3393_v26 }
0x1ac6   :  { %v4466_v27 = vld [vmem:[#allocation10 + $0x1] ss:$0 sm:$0xff] }
0x1ac8   :  { %v3469_v28 = vpop.f32.mrb[42].mxu0 }
0x1ac9   :  { %v4811_v29 = vpop.f32.mrb[43].mxu0  ;;  %4815 = vmatmul.mubr.msk.f32.vlgmr.msra.gmra.mrb[28].mxu1 %vm318_vm2, %v3469_v28 }
0x1aca   :  { %4823 = vmatpush3.xpose.msk.msra.mxu1 %vm318_vm2, %v3637_v23  ;;  %4824 = vmatprep.mubr.msk.f32.mxu1 %vm5321_vm1, %v5320_v15 }
0x1acb   :  { %4832 = vmatprep.subr.mxu1 %v5320_v15 }
0x1acc   :  { %v3630_v33 = vpop.f32.mrb[44].mxu0 }
0x1acd   :  { %v3712_v34 = vmul.f32 0.35355338, %v3630_v33  ;;  %v4821_v35 = vpop.f32.mrb[45].mxu0  ;;  %4825 = vmatmul.mubr.msk.f32.vlgmr.msra.gmra.mrb[32].mxu1 %vm318_vm2, %v3635_v30  ;;  %v4467_v33 = vld [vmem:[#allocation11 + $0x1] ss:$0 sm:$0xff] }
0x1ace   :  { %4834 = vmatprep.mubr.msk.f32.mxu1 %vm5321_vm1, %v5320_v15 }
0x1acf   :  { %v3714_v37 = vsel %vm318_vm2, %v3712_v34, -inf }
0x1ad0   :  { %3715 = vmax.xlane.f32.xlu0 %v3714_v37 }
0x1b5d   :  { %v3716_v38 = vpop.xlane.xlu0 %3715 }
0x1b5e   :  { %v3720_v42 = vsub.f32 %v3712_v34, %v3716_v38 }
0x1b60   :  { %v3722_v43 = vmul.f32 1.442695, %v3720_v42 }
0x1b62   :  { %5002 = vpow2.f32 %v3722_v43  ;;  %v4924_v43 = vld [vmem:[%s6079_s11 + $0x20] sm:$0xff]  }
0x1b6c   :  { %v5003_v44 = vpop.eup %5002 }
0x1b6d   :  { %v3726_v46 = vsel %vm318_vm2, %v5003_v44, 0.0 }
0x1b6e   :  { %3727 = vadd.xlane.f32.xlu0 %v3726_v46  ;;  %v4926_v46 = vld [vmem:[%s6079_s11 + $0x30] sm:$0xff]  }
0x1ba0   :  { %v3708_v47 = vpop.f32.mrb[32].mxu1 }
0x1ba1   :  { %v3713_v49 = vmul.f32 0.35355338, %v3708_v47  ;;  %v4826_v50 = vpop.f32.mrb[33].mxu1  ;;  %v4927_v47 = vld [vmem:[%s6079_s11 + $0x38] sm:$0xff]  }
0x1ba3   :  { %v3717_v51 = vsel %vm318_vm2, %v3713_v49, -inf }
0x1ba4   :  { %3718 = vmax.xlane.f32.xlu1 %v3717_v51 }
0x1bb5   :  { %3812 = vrot.lane.b32.xlu1 %v5832_v48, %s5331_s26 }
0x1bfb   :  { %v3728_v56 = vpop.xlane.xlu0 %3727 }
0x1c31   :  { %v3719_v52 = vpop.xlane.xlu1 %3718 }
0x1c32   :  { %v3721_v39 = vsub.f32 %v3713_v49, %v3719_v52  ;;  %v4468_v49 = vld [vmem:[#allocation14 + $0x1] ss:$0 sm:$0xff] }
0x1c34   :  { %v3724_v53 = vmul.f32 1.442695, %v3721_v39 }
0x1c35   :  { %v3813_v54 = vpop.permute.xlu1 %3812 }
0x1c36   :  { %5004 = vpow2.f32 %v3724_v53  ;;  %4833 = vmatpush3.msra.mxu1 %v3813_v54 }
0x1c37   :  { %5006 = vrcp.f32 %v3728_v56 }
0x1c40   :  { %v5005_v36 = vpop.eup %5004 }
0x1c41   :  { %v3729_v55 = vsel %vm318_vm2, %v5005_v36, 0.0  ;;  %v5007_v58 = vpop.eup %5006 }
0x1c42   :  { %3730 = vadd.xlane.f32.xlu0 %v3729_v55  ;;  %v3734_v59 = vmul.f32 %v5007_v58, %v5003_v44  ;;  %v4925_v44 = vld [vmem:[%s6079_s11 + $0x28] sm:$0xff]  }
0x1c58   :  { %3736 = vrot.lane.b32.xlu0 %v5830_v45, %s5331_s26  ;;  %v4432_v45 = vld [vmem:[%s6073_s5 + $0x38] sm:$0xff] }
0x1c59   :  { %4837 = vmatprep.subr.mxu1 %v4432_v45 }
0x1ccf   :  { %v3731_v57 = vpop.xlane.xlu0 %3730 }
0x1cd0   :  { %5008 = vrcp.f32 %v3731_v57 }
0x1cd3   :  { %v3737_v48 = vpop.permute.xlu0 %3736 }
0x1cd4   :  { %4828 = vmatpush3.msra.mxu0 %v3737_v48 }
0x1cd5   :  { %4830 = vmatmul.mubr.msk.f32.vlgmr.msra.gmra.mrb[46].mxu0 %vm318_vm2, %v3734_v59  ;;  %4842 = vmatprep.subr.bf16.mxu0 %v5320_v15 }
0x1cd6   :  { %4846 = vmatprep.mubr.msk.bf16.mxu0 %vm5321_vm1, %v5320_v15 }
0x1cda   :  { %v5009_v60 = vpop.eup %5008 }
0x1cdb   :  { %v3735_v61 = vmul.f32 %v5009_v60, %v5005_v36 }
0x1cdd   :  { %4835 = vmatmul.mubr.msk.f32.vlgmr.msra.gmra.mrb[34].mxu1 %vm318_vm2, %v3735_v61 }
0x1cde   :  { %4838 = vmatpush3.msra.mxu1 %v4432_v45 }
0x1cdf   :  { %4850 = vmatprep.subr.bf16.mxu1 %v5320_v15 }
0x1da8   :  { %v3808_v62 = vpop.f32.mrb[46].mxu0 }
0x1da9   :  { %v4831_v63 = vpop.f32.mrb[47].mxu0  ;;  %4839 = vmatprep.mubr.msk.f32.mxu1 %vm318_vm2, %v3808_v62 }
0x1db0   :  { %v3884_v0 = vpop.f32.mrb[34].mxu1 }
0x1db1   :  { %v4836_v1 = vpop.f32.mrb[35].mxu1  ;;  %4840 = vmatmul.mubr.msk.f32.vlgmr.msra.gmra.mrb[28].mxu1 %vm318_vm2, %v3884_v0 }
0x1db2   :  { %4858 = vmatprep.mubr.msk.bf16.mxu1 %vm5321_vm1, %v5320_v15  ;;  %4851 = vmatpush3.bf16.msra.mxu1 %v4924_v43  ;;  %v4488_v43 = vld [vmem:[%s6082_s14 + $0x1] ss:$0 sm:$0xff]  ;;  %s5332_s14 = smov [#allocation19]  }
0x1db3   :  { %4852 = vmatprep.subr.bf16.mxu1 %v5320_v15 }
0x1db6   :  { %4853 = vmatpush3.bf16.msra.mxu1 %v4925_v44 }
0x1db7   :  { %4854 = vmatprep.subr.bf16.mxu1 %v5320_v15 }
0x1dba   :  { %4855 = vmatpush3.bf16.msra.mxu1 %v4926_v46 }
0x1dbb   :  { %4856 = vmatprep.subr.bf16.mxu1 %v5320_v15 }
0x1dbe   :  { %4857 = vmatpush3.bf16.msra.mxu1 %v4927_v47 }
0x1e84   :  { %v4841_v3 = vpop.f32.mrb[28].mxu1 }
0x1e85   :  { %v3980_v4 = vadd.f32 %v4841_v3, %v4465_v2  ;;  %v3960_v5 = vpop.f32.mrb[29].mxu1 }
0x1e86   :  { %v3979_v6 = vadd.f32 %v4465_v2, %v3960_v5 }
0x1e87   :  { %v3982_v7 = vadd.f32 %v3980_v4, %v5823_v41 }
0x1e88   :  { %v3981_v8 = vadd.f32 %v3979_v6, %v5821_v40  ;;  %v4922_v40 = vld [vmem:[#allocation13 + $0x10] sm:$0xff]  }
0x1e89   :  { %v3990_v10 = vsel %vm199_vm0, %v3982_v7, 0.0  ;;  %4843 = vmatpush3.bf16.msra.mxu0 %v4922_v40 }
0x1e8a   :  { %3991 = vadd.xlane.f32.xlu0 %v3990_v10  ;;  %v3987_v11 = vsel %vm199_vm0, %v3981_v8, 0.0  ;;  %4844 = vmatprep.subr.bf16.mxu0 %v5320_v15 }
0x1e8b   :  { %3988 = vadd.xlane.f32.xlu1 %v3987_v11 }
0x1e8d   :  { %4845 = vmatpush3.bf16.msra.mxu0 %v4923_v20 }
0x1e8e   :  { %4862 = vmatprep.subr.bf16.mxu0 %v5320_v15 }
0x1f17   :  { %v3992_v12 = vpop.xlane.xlu0 %3991 }
0x1f18   :  { %v3994_v13 = vmul.f32 0.03125, %v3992_v12  ;;  %v3989_v32 = vpop.xlane.xlu1 %3988 }
0x1f19   :  { %v3993_v31 = vmul.f32 0.03125, %v3989_v32 }
0x1f1a   :  { %v3996_v14 = vsub.f32 %v3982_v7, %v3994_v13  ;;  %v4480_v7 = vld [vmem:[#allocation16 + $0x1] ss:$0 sm:$0xff] }
0x1f1b   :  { %v3995_v17 = vsub.f32 %v3981_v8, %v3993_v31 }
0x1f1c   :  { %v3998_v9 = vmul.f32 %v3996_v14, %v3996_v14 }
0x1f1d   :  { %v3997_v18 = vmul.f32 %v3995_v17, %v3995_v17 }
0x1f1e   :  { %v4002_v19 = vsel %vm199_vm0, %v3998_v9, 0.0 }
0x1f1f   :  { %4003 = vadd.xlane.f32.xlu1 %v4002_v19  ;;  %v3999_v41 = vsel %vm199_vm0, %v3997_v18, 0.0 }
0x1f20   :  { %4000 = vadd.xlane.f32.xlu0 %v3999_v41 }
0x1fac   :  { %v4004_v21 = vpop.xlane.xlu1 %4003 }
0x1fad   :  { %v4006_v22 = vmul.f32 0.03125, %v4004_v21  ;;  %v4001_v16 = vpop.xlane.xlu0 %4000 }
0x1fae   :  { %v4005_v23 = vmul.f32 0.03125, %v4001_v16 }
0x1faf   :  { %v4008_v24 = vadd.f32 1e-12, %v4006_v22 }
0x1fb0   :  { %v4007_v25 = vadd.f32 1e-12, %v4005_v23 }
0x1fb1   :  { %5010 = vrsqrt.f32 %v4008_v24 }
0x1fb2   :  { %5012 = vrsqrt.f32 %v4007_v25  ;;  %v4928_v25 = vld [vmem:[%s6083_s15] sm:$0xff]  }
0x1fbb   :  { %v5011_v26 = vpop.eup %5010 }
0x1fbc   :  { %v5013_v28 = vpop.eup %5012  ;;  %v4012_v29 = vmul.f32 %v5011_v26, %v3996_v14  ;;  %v4929_v26 = vld [vmem:[%s6083_s15 + $0x8] sm:$0xff]   ;;  %s4337_s15 = sshll.u32 %s5332_s14, 4  ;;  %s4338_s15 = int_to_ptr.vmem [resolvable:$true] %s4337_s15 }
0x1fbd   :  { %v4011_v30 = vmul.f32 %v5013_v28, %v3995_v17  ;;  %s5244_s3 = scalar_lea.vmem %s4338_s15, 256  ;;  %p5249_p11 = scmp.lt.s32.totalorder %s4338_s15, %s4338_s15 }
0x1fbe   :  { %v4020_v34 = vmul.f32 %v4466_v27, %v4012_v29  ;;  %p5245_p10 = scmp.ne.s32.totalorder %s4338_s15, %s5244_s3  ;;  %p5250_p12 = scmp.lt.s32.totalorder %s5244_s3, %s5244_s3 }
0x1fbf   :  { %v4019_v35 = vmul.f32 %v4466_v27, %v4011_v30 }
0x1fc0   :  { %v4028_v37 = vadd.f32 %v4467_v33, %v4020_v34  ;;  %p5251_p13 = por %p5250_p12, %p5249_p11 }
0x1fc1   :  { %v4027_v38 = vadd.f32 %v4467_v33, %v4019_v35 }
0x1fc2   :  { %p5252_p0 = pnand %p5251_p13, %p5245_p10 }
0x1fc3   :  { %v4029_v42 = vpack.c.bf16 %v4028_v37, %v4027_v38 }
0x1fc5   :  { %4847 = vmatmul.mubr.msk.bf16.vlgmr.msra.gmra.mrb[48].mxu0 %vm199_vm0, %v4029_v42 }
0x1fc6   :  { %4866 = vmatprep.mubr.msk.bf16.mxu0 %vm5321_vm1, %v5320_v15  ;;  %4863 = vmatpush3.bf16.msra.mxu0 %v4928_v25 }
0x1fc7   :  { %4864 = vmatprep.subr.bf16.mxu0 %v5320_v15 }
0x1fca   :  { %4865 = vmatpush3.bf16.msra.mxu0 %v4929_v26 }
0x2098   :  { %v4092_v50 = vpop.f32.mrb[48].mxu0 }
0x2099   :  { %v4093_v51 = vadd.f32 %v4468_v49, %v4092_v50  ;;  %v4848_v52 = vpop.f32.mrb[49].mxu0 }
0x209a   :  { %v4095_v39 = vpop.f32.mrb[50].mxu0 }
0x209b   :  { %v4101_v53 = vmul.f32 0.044715, %v4093_v51  ;;  %v4096_v54 = vadd.f32 %v4468_v49, %v4095_v39  ;;  %v4849_v36 = vpop.f32.mrb[51].mxu0  ;;  %v4099_v1 = vmul.f32 0.5, %v4093_v51 }
0x209d   :  { %v4103_v55 = vmul.f32 %v4101_v53, %v4093_v51  ;;  %v4102_v56 = vmul.f32 0.044715, %v4096_v54  ;;  %v4100_v2 = vmul.f32 0.5, %v4096_v54 }
0x209f   :  { %v4105_v57 = vmul.f32 %v4103_v55, %v4093_v51  ;;  %v4104_v58 = vmul.f32 %v4102_v56, %v4096_v54 }
0x20a1   :  { %v4107_v59 = vadd.f32 %v4105_v57, %v4093_v51  ;;  %v4106_v48 = vmul.f32 %v4104_v58, %v4096_v54 }
0x20a3   :  { %v4109_v60 = vmul.f32 0.7978846, %v4107_v59  ;;  %v4108_v61 = vadd.f32 %v4106_v48, %v4096_v54 }
0x20a5   :  { %5014 = vtanh.f32 %v4109_v60  ;;  %v4110_v45 = vmul.f32 0.7978846, %v4108_v61 }
0x20a7   :  { %5016 = vtanh.f32 %v4110_v45 }
0x20af   :  { %v5015_v62 = vpop.eup %5014 }
0x20b0   :  { %v4113_v63 = vadd.f32 1.0, %v5015_v62 }
0x20b1   :  { %v5017_v0 = vpop.eup %5016 }
0x20b2   :  { %v4114_v3 = vadd.f32 1.0, %v5017_v0  ;;  %v4115_v4 = vmul.f32 %v4113_v63, %v4099_v1 }
0x20b4   :  { %v4116_v5 = vmul.f32 %v4114_v3, %v4100_v2 }
0x20b6   :  { %v4117_v6 = vpack.c.bf16 %v4116_v5, %v4115_v4 }
0x20b8   :  { %4859 = vmatmul.mubr.msk.bf16.vlgmr.msra.gmra.mrb[36].mxu1 %vm2151_vm3, %v4117_v6 }
0x218b   :  { %v4196_v8 = vpop.f32.mrb[36].mxu1 }
0x218c   :  { %v4197_v10 = vadd.f32 %v4480_v7, %v4196_v8  ;;  %v4860_v11 = vpop.f32.mrb[37].mxu1 }
0x218d   :  { %v4199_v12 = vpop.f32.mrb[38].mxu1 }
0x218e   :  { %v4200_v13 = vadd.f32 %v4480_v7, %v4199_v12  ;;  %v4861_v32 = vpop.f32.mrb[39].mxu1  ;;  %v4203_v31 = vadd.f32 %v4197_v10, %v4027_v38 }
0x2190   :  { %v4209_v14 = vsel %vm199_vm0, %v4203_v31, 0.0  ;;  %v4204_v17 = vadd.f32 %v4200_v13, %v4028_v37  ;;  %v4487_v37 = vld [vmem:[#allocation17 + $0x1] ss:$0 sm:$0xff] }
0x2191   :  { %4210 = vadd.xlane.f32.xlu1 %v4209_v14 }
0x2192   :  { %v4212_v9 = vsel %vm199_vm0, %v4204_v17, 0.0 }
0x2193   :  { %4213 = vadd.xlane.f32.xlu0 %v4212_v9 }
0x221e   :  { %v4211_v18 = vpop.xlane.xlu1 %4210 }
0x221f   :  { %v4215_v19 = vmul.f32 0.03125, %v4211_v18 }
0x2220   :  { %v4214_v41 = vpop.xlane.xlu0 %4213 }
0x2221   :  { %v4217_v40 = vsub.f32 %v4203_v31, %v4215_v19  ;;  %v4216_v20 = vmul.f32 0.03125, %v4214_v41 }
0x2223   :  { %v4218_v21 = vsub.f32 %v4204_v17, %v4216_v20  ;;  %v4219_v22 = vmul.f32 %v4217_v40, %v4217_v40 }
0x2225   :  { %v4221_v16 = vsel %vm199_vm0, %v4219_v22, 0.0  ;;  %v4220_v23 = vmul.f32 %v4218_v21, %v4218_v21 }
0x2226   :  { %4222 = vadd.xlane.f32.xlu1 %v4221_v16 }
0x2227   :  { %v4224_v24 = vsel %vm199_vm0, %v4220_v23, 0.0 }
0x2228   :  { %4225 = vadd.xlane.f32.xlu0 %v4224_v24 }
0x22b3   :  { %v4223_v27 = vpop.xlane.xlu1 %4222 }
0x22b4   :  { %v4227_v28 = vmul.f32 0.03125, %v4223_v27 }
0x22b5   :  { %v4226_v29 = vpop.xlane.xlu0 %4225 }
0x22b6   :  { %v4229_v30 = vadd.f32 1e-12, %v4227_v28  ;;  %v4228_v33 = vmul.f32 0.03125, %v4226_v29 }
0x22b8   :  { %5018 = vrsqrt.f32 %v4229_v30  ;;  %v4230_v34 = vadd.f32 1e-12, %v4228_v33 }
0x22ba   :  { %5020 = vrsqrt.f32 %v4230_v34 }
0x22c2   :  { %v5019_v35 = vpop.eup %5018 }
0x22c3   :  { %v4233_v38 = vmul.f32 %v5019_v35, %v4217_v40 }
0x22c4   :  { %v5021_v42 = vpop.eup %5020 }
0x22c5   :  { %v4241_v44 = vmul.f32 %v4487_v37, %v4233_v38  ;;  %v4234_v46 = vmul.f32 %v5021_v42, %v4218_v21 }
0x22c7   :  { %v4249_v15 = vadd.f32 %v4488_v43, %v4241_v44  ;;  %v4242_v47 = vmul.f32 %v4487_v37, %v4234_v46 }
0x22c9   :  { %4251 = vst.msk [vmem:[#allocation19] sm:$0xff] %vm199_vm0, %v4249_v15  ;;  %v4250_v49 = vadd.f32 %v4488_v43, %v4242_v47  ;;  %v4253_v50 = vpack.c.bf16 %v4249_v15, %v4249_v15 }
0x22cb   :  { %4252 = vst.msk [vmem:[#allocation19 + $0x8] sm:$0xff] %vm199_vm0, %v4250_v49  ;;  %v4254_v51 = vpack.c.bf16 %v4250_v49, %v4250_v49  ;;  %v4268_v39 = vunpack.c.l.b16 %v4253_v50 }
0x22cd   :  { %v4269_v52 = vunpack.c.l.b16 %v4254_v51 }
0x22cf   :  { %v4270_v53 = vrot.slane %v4269_v52, 7 }
0x22d1   :  { %v4272_v54 = vsel %vm4271_vm4, %v4270_v53, %v4268_v39 }
0x22d2   :  { %v4273_v36 = vpack.c.b16 %v4272_v54, %v4272_v54 }
0x22d4   :  { %4867 = vmatmul.mubr.msk.bf16.vlgmr.msra.gmra.mrb[52].mxu0 %vm199_vm0, %v4273_v36 }
0x22d5   :  { %5255 = shalt.err (!%p5252_p0)
}
0x22d6   :  { %s5256_s9 = scalar_lea.hbm %s6085_s17, 256 }
0x22d7   :  { %p5257_p1 = scmp.ne.s32.totalorder %s6085_s17, %s5256_s9  ;;  %p5260_p2 = scmp.lt.u32.totalorder %s5256_s9, %s6085_s17 }
0x22d9   :  { %p5262_p3 = pnand %p5260_p2, %p5257_p1 }
0x22db   :  { %5265 = shalt.err (!%p5262_p3)
}
0x22dc   :  { %4343 = dma.vmem_to_hbm [thread:$0]  %s4338_s15, 256, %s6085_s17, [#allocation4], %s5311_s10, %s5311_s10, %s5312_s25   ;;  %vm4330_vm5 = vcmask 254976  }
0x22dd   :  { %v4489_v55 = vld [vmem:[%s6084_s16] ss:$0 sm:$0xff]  ;;  %s5333_s30 = smov [#allocation20]  }
0x22de   :  { %s4350_s26 = sshll.u32 %s5333_s30, 4  ;;  %s4351_s26 = int_to_ptr.vmem [resolvable:$true] %s4350_s26 }
0x22df   :  { %s5266_s27 = scalar_lea.vmem %s4351_s26, 32  ;;  %p5271_p5 = scmp.lt.s32.totalorder %s4351_s26, %s4351_s26 }
0x22e0   :  { %p5267_p4 = scmp.ne.s32.totalorder %s4351_s26, %s5266_s27  ;;  %p5272_p6 = scmp.lt.s32.totalorder %s5266_s27, %s5266_s27 }
0x22e2   :  { %p5273_p7 = por %p5272_p6, %p5271_p5 }
0x22e4   :  { %p5274_p8 = pnand %p5273_p7, %p5267_p4 }
0x23a7   :  { %v4323_v56 = vpop.f32.mrb[52].mxu0 }
0x23a8   :  { %v4324_v57 = vadd.f32 %v4489_v55, %v4323_v56  ;;  %v4868_v58 = vpop.f32.mrb[53].mxu0 }
0x23a9   :  { %v4326_v59 = vpop.f32.mrb[54].mxu0 }
0x23aa   :  { %5022 = vtanh.f32 %v4324_v57  ;;  %v4869_v48 = vpop.f32.mrb[55].mxu0 }
0x23b4   :  { %v5023_v60 = vpop.eup %5022 }
0x23b5   :  { %4331 = vst.msk [vmem:[#allocation20] sm:$0x3] %vm4330_vm5, %v5023_v60 }
0x23b6   :  { %5277 = shalt.err (!%p5274_p8)
}
0x23b7   :  { %s5278_s10 = scalar_lea.hbm %s6086_s18, 32 }
0x23b8   :  { %p5279_p9 = scmp.ne.s32.totalorder %s6086_s18, %s5278_s10  ;;  %p5282_p10 = scmp.lt.u32.totalorder %s5278_s10, %s6086_s18 }
0x23ba   :  { %p5284_p11 = pnand %p5282_p10, %p5279_p9 }
0x23bc   :  { %5287 = shalt.err (!%p5284_p11)
}
0x23bd   :  { %4353 = dma.vmem_to_hbm [thread:$0]  %s4351_s26, 32, %s6086_s18, [#allocation21]  }
0x23be   :  { %5300 = dma.done.wait [#allocation4], 256  }
0x23bf   :  { %5301 = vsyncadd [#allocation4], 4294967040 }
0x23c0   :  { %5302 = dma.done.wait [#allocation21], 32  }
0x23c1   :  { %5303 = vsyncadd [#allocation21], 4294967264 }
0x23c2   :  { %4360 = vsyncpa [#allocation3], 1 }
0x23c3   :  { %4361 = vsyncpa [#allocation6], 1 }
0x23c4   :  { %4362 = vsyncpa [#allocation9], 1 }
0x23c5   :  { %4363 = vsyncpa [#allocation12], 1 }
0x23c6   :  { %4364 = vsyncpa [#allocation15], 1 }
0x23c7   :  { %4365 = vsyncpa [#allocation18], 1 }
0x23c8   :  { %4366 = vsyncpa [#allocation4], 1 }
0x23c9   :  { %4367 = vsyncpa [#allocation21], 1 }

</bundles_post_ra>
